<compile_context>
chip_gen: v7x
topology: tpu7x:2x2x1
jax: 0.10.0
libtpu: 0.0.40
codegen_flags: <defaults>
</compile_context>

<pallas_src>
import math
from functools import partial

import jax
import jax.numpy as jnp
from jax.experimental import pallas as pl
from jax.experimental.pallas import tpu as pltpu


# Above the 16 MiB (v5e) / 32 MiB (v6e, v7x) scoped defaults, below v7x's
# 64 MiB physical VMEM.
_VMEM_LIMIT_BYTES = 48 * 1024 * 1024


# ----------------------------------------------------------------------------
# Kernel 1: fused preprocessing, gridded over the batch axis ("parallel").
# ----------------------------------------------------------------------------
def _preprocess_kernel(m_ref, hidden_ref, in_w_ref, in_b_ref, pe_ref,
                       id_e_ref, id_w1_ref, id_b1_ref, id_w2_ref, id_b2_ref,
                       emo_e_ref, emo_w1_ref, emo_b1_ref, emo_w2_ref, emo_b2_ref,
                       o_ref, *, interp_first):
    f32, bf16 = jnp.float32, jnp.bfloat16

    def embed_mlp(e_ref, w1_ref, b1_ref, w2_ref, b2_ref):          # (1,256) -> (1,D)
        h = jnp.dot(e_ref[...], w1_ref[...], preferred_element_type=f32) + b1_ref[...]
        h = jnp.maximum(h, 0.2 * h)                                 # LeakyReLU(0.2)
        return jnp.dot(h.astype(bf16), w2_ref[...],
                       preferred_element_type=f32) + b2_ref[...]

    id_emb = embed_mlp(id_e_ref, id_w1_ref, id_b1_ref, id_w2_ref, id_b2_ref)
    emo_emb = embed_mlp(emo_e_ref, emo_w1_ref, emo_b1_ref, emo_w2_ref, emo_b2_ref)

    m = m_ref[...]                                # (S, T) bf16 interpolation matrix
    hid = hidden_ref[...]                         # (T, H) bf16, this batch element
    if interp_first:                              # (M @ X) @ W
        xs = jnp.dot(m, hid, preferred_element_type=f32)                        # (S, H)
        xs = jnp.dot(xs.astype(bf16), in_w_ref[...], preferred_element_type=f32)
    else:                                         # M @ (X @ W)
        xt = jnp.dot(hid, in_w_ref[...], preferred_element_type=f32)            # (T, D)
        xs = jnp.dot(m, xt.astype(bf16), preferred_element_type=f32)
    # in_fn bias + pe[:B] + id_embed + emo_embed (per-batch rows, broadcast over S)
    xs = xs + in_b_ref[...] + pe_ref[...] + id_emb + emo_emb
    o_ref[...] = xs.astype(o_ref.dtype)           # (S, D) bf16, lane-dense store


def preprocess(hidden_bf16, m_bf16, pe_rows, id_rows, emo_rows,
               in_fn, identity, emotion, *, interp_first):
    B, T, H = hidden_bf16.shape
    S = m_bf16.shape[0]
    D = in_fn["w"].shape[1]
    assert D % 128 == 0, "d_model must be a multiple of 128 (lane-dense packed output)"

    def const(shape):                              # whole-array, resident across the grid
        n = len(shape)
        return pl.BlockSpec(shape, lambda b, _n=n: (0,) * _n)

    def per_b(last2):                              # one squeezed batch row per grid step
        return pl.BlockSpec((None,) + last2, lambda b: (b, 0, 0))

    in_specs = [
        const((S, T)),                                      # m
        per_b((T, H)),                                      # hidden[b]
        const(in_fn["w"].shape), const((1, D)),             # in_fn
        per_b((1, D)),                                      # pe[b]
        per_b((1, 256)),                                    # identity embedding row
        const(identity["fc1_w"].shape), const(identity["fc1_b"].shape),
        const(identity["fc2_w"].shape), const(identity["fc2_b"].shape),
        per_b((1, 256)),                                    # emotion embedding row
        const(emotion["fc1_w"].shape), const(emotion["fc1_b"].shape),
        const(emotion["fc2_w"].shape), const(emotion["fc2_b"].shape),
    ]
    return pl.pallas_call(
        partial(_preprocess_kernel, interp_first=interp_first),
        out_shape=jax.ShapeDtypeStruct((S, B * D), jnp.bfloat16),
        grid=(B,),
        in_specs=in_specs,
        out_specs=pl.BlockSpec((S, D), lambda b: (0, b)),   # packed (S, B*D): block b
        compiler_params=pltpu.CompilerParams(
            dimension_semantics=("parallel",),
            vmem_limit_bytes=_VMEM_LIMIT_BYTES),
    )(m_bf16, hidden_bf16, in_fn["w"], in_fn["b"], pe_rows,
      id_rows, identity["fc1_w"], identity["fc1_b"], identity["fc2_w"], identity["fc2_b"],
      emo_rows, emotion["fc1_w"], emotion["fc1_b"], emotion["fc2_w"], emotion["fc2_b"])


# ----------------------------------------------------------------------------
# Kernel 2: the whole TransformerEncoder stack + out_fn in one pallas_call.
#   grid = (row_blocks ["parallel"], num_layers ["arbitrary"])
#   activations: 2-D (rows, D) with rows ordered (s, b) and attention over the
#   b groups of length L = B (the module feeds (B,S,D) into a seq-first encoder).
# ----------------------------------------------------------------------------
def _encoder_stack_kernel(x_ref, qkv_w_ref, qkv_b_ref, aow_ref, aob_ref,
                          f1w_ref, f1b_ref, f2w_ref, f2b_ref,
                          g1_ref, be1_ref, g2_ref, be2_ref,
                          pw_ref, pb_ref,
                          enc_ref, out_ref, carry_ref,
                          *, nhead, num_layers, attn_len, eps):
    f32, bf16 = jnp.float32, jnp.bfloat16
    l = pl.program_id(1)
    rows, D = carry_ref.shape
    L = attn_len
    bs = rows // L
    dh = D // nhead

    @pl.when(l == 0)
    def _():                                       # load activation once per row-block
        carry_ref[...] = x_ref[...].astype(f32)

    x2 = carry_ref[...]                            # (rows, D) f32

    def layer_norm(y, g_ref, b_ref):
        mu = jnp.mean(y, axis=-1, keepdims=True)
        var = jnp.mean(jnp.square(y - mu), axis=-1, keepdims=True)
        return (y - mu) * jax.lax.rsqrt(var + eps) * g_ref[...] + b_ref[...]

    # ---- multi-head self-attention (1/sqrt(dh) pre-folded into Q weights) -----
    qkv = (jnp.dot(x2.astype(bf16), qkv_w_ref[...], preferred_element_type=f32)
           + qkv_b_ref[...]).astype(bf16)          # (rows, 3D) bf16: largest live tensor
    qkv3 = qkv.reshape(bs, L, 3 * D)
    # heads stacked onto the batch axis -> one score matmul / softmax / PV matmul
    qh = jnp.concatenate([qkv3[:, :, h * dh:(h + 1) * dh]
                          for h in range(nhead)], axis=0)           # (bs*nhead, L, dh)
    kh = jnp.concatenate([qkv3[:, :, D + h * dh:D + (h + 1) * dh]
                          for h in range(nhead)], axis=0)
    vh = jnp.concatenate([qkv3[:, :, 2 * D + h * dh:2 * D + (h + 1) * dh]
                          for h in range(nhead)], axis=0)
    s = jnp.einsum('bqd,bkd->bqk', qh, kh, preferred_element_type=f32)
    s = s - jnp.max(s, axis=-1, keepdims=True)
    p = jnp.exp(s)
    p = p * pl.reciprocal(jnp.sum(p, axis=-1, keepdims=True), approx=True)
    ah = jnp.einsum('bqk,bkd->bqd', p.astype(bf16), vh,
                    preferred_element_type=f32)                     # (bs*nhead, L, dh)
    attn = jnp.concatenate([ah[h * bs:(h + 1) * bs] for h in range(nhead)],
                           axis=-1).reshape(rows, D)                # back to (rows, D)
    attn = jnp.dot(attn.astype(bf16), aow_ref[...],
                   preferred_element_type=f32) + aob_ref[...]       # out_proj
    x1 = layer_norm(x2 + attn, g1_ref, be1_ref)                     # norm1(x + attn)

    # ---- feed-forward ----------------------------------------------------------
    ff = jnp.dot(x1.astype(bf16), f1w_ref[...], preferred_element_type=f32) + f1b_ref[...]
    ff = jnp.maximum(ff, 0.0)                                       # ReLU
    ff = jnp.dot(ff.astype(bf16), f2w_ref[...], preferred_element_type=f32) + f2b_ref[...]
    y = layer_norm(x1 + ff, g2_ref, be2_ref)                        # norm2(x + ff)
    carry_ref[...] = y                                              # carried to next layer

    @pl.when(l == num_layers - 1)
    def _():                                       # single HBM writeback + fused out_fn
        enc_ref[...] = y.astype(enc_ref.dtype)
        out_ref[...] = (jnp.dot(y.astype(bf16), pw_ref[...],
                                preferred_element_type=f32)
                        + pb_ref[...]).astype(out_ref.dtype)


def _choose_block_s(S, L):
    """Row-block size along S: aim for >= 256 rows per block (fills the 256x256
    MXU on v6e/v7x) while keeping block rows a multiple of 8 (or full) and
    S % bs == 0."""
    target = max(1, 256 // max(L, 1))
    for cand in range(min(S, target), 0, -1):
        if S % cand == 0 and ((cand * L) % 8 == 0 or cand == S):
            return cand
    return S


def encoder_stack(x_rows, enc, out_fn, *, nhead, attn_len):
    R, D = x_rows.shape
    L = attn_len
    assert R % L == 0 and D % nhead == 0
    S = R // L
    num_layers = enc["qkv_w"].shape[0]
    F = enc["ff1_w"].shape[2]
    out_pad = out_fn["w"].shape[1]

    bs = _choose_block_s(S, L)
    rows_blk = bs * L
    grid = (S // bs, num_layers)                   # layer axis innermost ("arbitrary")

    xmap = lambda i, l: (i, 0)                     # activation/output blocks: revisited over l
    wmap = lambda i, l: (l, 0, 0)                  # per-layer weights: streamed (double-buffered)
    cmap = lambda i, l: (0, 0)                     # out_fn weights: resident

    in_specs = [
        pl.BlockSpec((rows_blk, D), xmap),
        pl.BlockSpec((None, D, 3 * D), wmap), pl.BlockSpec((None, 1, 3 * D), wmap),
        pl.BlockSpec((None, D, D), wmap),     pl.BlockSpec((None, 1, D), wmap),
        pl.BlockSpec((None, D, F), wmap),     pl.BlockSpec((None, 1, F), wmap),
        pl.BlockSpec((None, F, D), wmap),     pl.BlockSpec((None, 1, D), wmap),
        pl.BlockSpec((None, 1, D), wmap),     pl.BlockSpec((None, 1, D), wmap),
        pl.BlockSpec((None, 1, D), wmap),     pl.BlockSpec((None, 1, D), wmap),
        pl.BlockSpec((D, out_pad), cmap),     pl.BlockSpec((1, out_pad), cmap),
    ]
    out_specs = (pl.BlockSpec((rows_blk, D), xmap),
                 pl.BlockSpec((rows_blk, out_pad), xmap))
    out_shape = (jax.ShapeDtypeStruct((R, D), jnp.bfloat16),
                 jax.ShapeDtypeStruct((R, out_pad), jnp.float32))

    return pl.pallas_call(
        partial(_encoder_stack_kernel, nhead=nhead, num_layers=num_layers,
                attn_len=L, eps=1e-5),
        out_shape=out_shape,
        grid=grid,
        in_specs=in_specs,
        out_specs=out_specs,
        scratch_shapes=[pltpu.VMEM((rows_blk, D), jnp.float32)],   # cross-layer carry
        compiler_params=pltpu.CompilerParams(
            dimension_semantics=("parallel", "arbitrary"),
            vmem_limit_bytes=_VMEM_LIMIT_BYTES),
    )(x_rows, enc["qkv_w"], enc["qkv_b"], enc["out_w"], enc["out_b"],
      enc["ff1_w"], enc["ff1_b"], enc["ff2_w"], enc["ff2_b"],
      enc["ln1_g"], enc["ln1_b"], enc["ln2_g"], enc["ln2_b"],
      out_fn["w"], out_fn["b"])


# ----------------------------------------------------------------------------
# Host-side helpers (tiny XLA glue)
# ----------------------------------------------------------------------------
def _interp_matrix(t_in, s_out):
    """(s_out, t_in) matrix M with M @ x == F.interpolate(x, size=s_out,
    mode='linear', align_corners=True) along the time axis."""
    if s_out == 1:
        pos = jnp.zeros((1,), jnp.float32)
    else:
        pos = jnp.arange(s_out, dtype=jnp.float32) * ((t_in - 1) / (s_out - 1))
    i0 = jnp.clip(jnp.floor(pos).astype(jnp.int32), 0, t_in - 1)
    i1 = jnp.clip(i0 + 1, 0, t_in - 1)
    frac = pos - i0.astype(jnp.float32)
    rows = jnp.arange(s_out)
    m = jnp.zeros((s_out, t_in), jnp.float32)
    m = m.at[rows, i0].add(1.0 - frac)
    m = m.at[rows, i1].add(frac)
    return m


def positional_encoding_table(max_len, d_model):
    position = jnp.arange(max_len, dtype=jnp.float32)[:, None]
    div_term = jnp.exp(jnp.arange(0, d_model, 2, dtype=jnp.float32)
                       * (-math.log(10000.0) / d_model))
    ang = position * div_term
    pe = jnp.zeros((max_len, d_model), jnp.float32)
    pe = pe.at[:, 0::2].set(jnp.sin(ang))
    pe = pe.at[:, 1::2].set(jnp.cos(ang))
    return pe


class _Keys:
    def __init__(self, key):
        self._key = key

    def __call__(self):
        self._key, sub = jax.random.split(self._key)
        return sub


def init_params(key, *, d_model, nhead, num_layers, hidden_size, out_dim,
                identity_dim, emo_dim, dim_feedforward, max_len):
    keys = _Keys(key)
    dh = d_model // nhead
    scale = 1.0 / math.sqrt(dh)

    def w_f32(k_in, k_out, s=0.02):
        return jax.random.normal(keys(), (k_in, k_out), jnp.float32) * s

    def b_f32(k_out, s=0.02):
        return jax.random.normal(keys(), (1, k_out), jnp.float32) * s

    def embed_mlp_params(vocab):
        return {
            "emb": jax.random.normal(keys(), (vocab, 256), jnp.float32) * 0.02,
            "fc1_w": w_f32(256, 512).astype(jnp.bfloat16), "fc1_b": b_f32(512),
            "fc2_w": w_f32(512, d_model).astype(jnp.bfloat16), "fc2_b": b_f32(d_model),
        }

    layers = []
    for _ in range(num_layers):
        qkv_w = w_f32(d_model, 3 * d_model)
        qkv_b = b_f32(3 * d_model)
        # fold the attention 1/sqrt(dh) into the Q projection (host-side, free)
        qkv_w = qkv_w.at[:, :d_model].multiply(scale)
        qkv_b = qkv_b.at[:, :d_model].multiply(scale)
        layers.append({
            "qkv_w": qkv_w.astype(jnp.bfloat16), "qkv_b": qkv_b,
            "out_w": w_f32(d_model, d_model).astype(jnp.bfloat16), "out_b": b_f32(d_model),
            "ff1_w": w_f32(d_model, dim_feedforward).astype(jnp.bfloat16),
            "ff1_b": b_f32(dim_feedforward),
            "ff2_w": w_f32(dim_feedforward, d_model).astype(jnp.bfloat16),
            "ff2_b": b_f32(d_model),
            "ln1_g": jnp.ones((1, d_model), jnp.float32),
            "ln1_b": jnp.zeros((1, d_model), jnp.float32),
            "ln2_g": jnp.ones((1, d_model), jnp.float32),
            "ln2_b": jnp.zeros((1, d_model), jnp.float32),
        })
    # stack per-layer weights with a leading layer axis (streamed by the layer grid axis)
    enc = {k: jnp.stack([lp[k] for lp in layers], axis=0) for k in layers[0]}

    out_pad = ((out_dim + 127) // 128) * 128       # lane-dense final store, sliced in XLA
    return {
        "identity": embed_mlp_params(identity_dim),
        "emotion": embed_mlp_params(emo_dim),
        "in_fn": {"w": w_f32(hidden_size, d_model).astype(jnp.bfloat16),
                  "b": b_f32(d_model)},
        # out_fn is zero-initialized exactly as in the reference __init__
        "out_fn": {"w": jnp.zeros((d_model, out_pad), jnp.bfloat16),
                   "b": jnp.zeros((1, out_pad), jnp.float32)},
        "enc": enc,
        "pe": positional_encoding_table(max_len, d_model),
    }


# ----------------------------------------------------------------------------
# Forward pass
# ----------------------------------------------------------------------------
def hubert_feature_extractor_forward(params, hidden_states, seq_len, id_, emo,
                                     *, nhead, out_dim, return_encoded=False):
    # TODO(synk): HubertModel.from_pretrained(...) (frozen HF audio encoder) is not
    # reimplemented; `hidden_states` is its last_hidden_state, taken as input.
    B, T, H = hidden_states.shape
    D = params["in_fn"]["w"].shape[1]
    S = int(seq_len)

    # tiny XLA gathers for the embedding lookups; their MLPs run inside kernel 1
    id_rows = jnp.take(params["identity"]["emb"], id_[:, 0], axis=0
                       ).astype(jnp.bfloat16)[:, None, :]                 # (B, 1, 256)
    emo_rows = jnp.take(params["emotion"]["emb"], emo[:, 0], axis=0
                        ).astype(jnp.bfloat16)[:, None, :]                # (B, 1, 256)
    pe_rows = params["pe"][:B][:, None, :]                                # pe[:x.size(0)]

    m = _interp_matrix(T, S).astype(jnp.bfloat16)                         # (S, T)
    hidden_bf16 = hidden_states.astype(jnp.bfloat16)
    # cheaper association of (M @ X) @ W vs M @ (X @ W)
    interp_first = (S * T * H + S * H * D) <= (T * H * D + S * T * D)

    # packed (S, B*D) so the flatten below is a free contiguous reshape; rows are
    # seq-major: row s*B + b == layer_in[b, s, :].  The module feeds (B, S, D)
    # into a seq-first encoder, so attention length = B and S is the batch axis.
    packed = preprocess(hidden_bf16, m, pe_rows, id_rows, emo_rows,
                        params["in_fn"], params["identity"], params["emotion"],
                        interp_first=interp_first)
    x_rows = packed.reshape(S * B, D)                                     # bf16 rows

    enc_rows, out_rows = encoder_stack(x_rows, params["enc"], params["out_fn"],
                                       nhead=nhead, attn_len=B)

    out = out_rows[:, :out_dim].reshape(S, B, out_dim).transpose(1, 0, 2)  # (B, S, out)
    if return_encoded:
        encoded = enc_rows.astype(jnp.float32).reshape(S, B, D).transpose(1, 0, 2)
        return out, encoded
    return out


# ----------------------------------------------------------------------------
# Main
# ----------------------------------------------------------------------------
if __name__ == "__main__":
    # Small config consistent with the module's constructor arguments
    # (d_model/nhead/num_layers scaled down; HIDDEN stands in for HuBERT's 768).
    B = 2
    T_H = 12            # HuBERT output frames
    HIDDEN = 64         # HuBERT hidden_size (stand-in)
    SEQ_LEN = 8         # interpolation target length
    D_MODEL = 128
    NHEAD = 4
    NUM_LAYERS = 2
    DIM_FF = 512
    OUT_DIM = 16
    IDENTITY_DIM = 8
    EMO_DIM = 4
    MAX_LEN = 64

    root = jax.random.PRNGKey(0)
    k_params, k_hs = jax.random.split(root)

    params = init_params(
        k_params, d_model=D_MODEL, nhead=NHEAD, num_layers=NUM_LAYERS,
        hidden_size=HIDDEN, out_dim=OUT_DIM, identity_dim=IDENTITY_DIM,
        emo_dim=EMO_DIM, dim_feedforward=DIM_FF, max_len=MAX_LEN)

    hidden_states = jax.random.normal(k_hs, (B, T_H, HIDDEN), jnp.float32)
    id_ = jnp.array([[1], [3]], jnp.int32)     # (B, 1) identity indices
    emo = jnp.array([[0], [2]], jnp.int32)     # (B, 1) emotion indices

    out, encoded = hubert_feature_extractor_forward(
        params, hidden_states, SEQ_LEN, id_, emo,
        nhead=NHEAD, out_dim=OUT_DIM, return_encoded=True)
    out = jax.block_until_ready(out)
    encoded = jax.block_until_ready(encoded)

    assert out.shape == (B, SEQ_LEN, OUT_DIM), out.shape
    assert encoded.shape == (B, SEQ_LEN, D_MODEL), encoded.shape
    assert bool(jnp.all(jnp.isfinite(encoded)))
    assert bool(jnp.all(jnp.isfinite(out)))
    # out_fn is zero-initialized in __init__, so the forward output is exactly zero.
    assert float(jnp.max(jnp.abs(out))) == 0.0

    print("KERNEL_OK")
</pallas_src>

<mosaic_0001>
module attributes {stable_mosaic.version = 11 : i64} {
  func.func @_preprocess_kernel(%arg0: i32, %arg1: memref<8x12xbf16, #tpu.memory_space<vmem>>, %arg2: memref<1x12x64xbf16, #tpu.memory_space<vmem>>, %arg3: memref<64x128xbf16, #tpu.memory_space<vmem>>, %arg4: memref<1x128xf32, #tpu.memory_space<vmem>>, %arg5: memref<1x1x128xf32, #tpu.memory_space<vmem>>, %arg6: memref<1x1x256xbf16, #tpu.memory_space<vmem>>, %arg7: memref<256x512xbf16, #tpu.memory_space<vmem>>, %arg8: memref<1x512xf32, #tpu.memory_space<vmem>>, %arg9: memref<512x128xbf16, #tpu.memory_space<vmem>>, %arg10: memref<1x128xf32, #tpu.memory_space<vmem>>, %arg11: memref<1x1x256xbf16, #tpu.memory_space<vmem>>, %arg12: memref<256x512xbf16, #tpu.memory_space<vmem>>, %arg13: memref<1x512xf32, #tpu.memory_space<vmem>>, %arg14: memref<512x128xbf16, #tpu.memory_space<vmem>>, %arg15: memref<1x128xf32, #tpu.memory_space<vmem>>, %arg16: memref<8x128xbf16, #tpu.memory_space<vmem>>) attributes {dimension_semantics = [#tpu.dimension_semantics<parallel>], iteration_bounds = array<i64: 2>, scalar_prefetch = 0 : i64, scratch_operands = 0 : i64, tpu.core_type = #tpu.core_type<tc>, window_params = [{pipeline_mode = #tpu.pipeline_mode<synchronous>, transform_indices = @transform_0, window_bounds = array<i64: 8, 12>}, {transform_indices = @transform_1, window_bounds = array<i64: 1, 12, 64>}, {pipeline_mode = #tpu.pipeline_mode<synchronous>, transform_indices = @transform_2, window_bounds = array<i64: 64, 128>}, {pipeline_mode = #tpu.pipeline_mode<synchronous>, transform_indices = @transform_3, window_bounds = array<i64: 1, 128>}, {transform_indices = @transform_4, window_bounds = array<i64: 1, 1, 128>}, {transform_indices = @transform_5, window_bounds = array<i64: 1, 1, 256>}, {pipeline_mode = #tpu.pipeline_mode<synchronous>, transform_indices = @transform_6, window_bounds = array<i64: 256, 512>}, {pipeline_mode = #tpu.pipeline_mode<synchronous>, transform_indices = @transform_7, window_bounds = array<i64: 1, 512>}, {pipeline_mode = #tpu.pipeline_mode<synchronous>, transform_indices = @transform_8, window_bounds = array<i64: 512, 128>}, {pipeline_mode = #tpu.pipeline_mode<synchronous>, transform_indices = @transform_9, window_bounds = array<i64: 1, 128>}, {transform_indices = @transform_10, window_bounds = array<i64: 1, 1, 256>}, {pipeline_mode = #tpu.pipeline_mode<synchronous>, transform_indices = @transform_11, window_bounds = array<i64: 256, 512>}, {pipeline_mode = #tpu.pipeline_mode<synchronous>, transform_indices = @transform_12, window_bounds = array<i64: 1, 512>}, {pipeline_mode = #tpu.pipeline_mode<synchronous>, transform_indices = @transform_13, window_bounds = array<i64: 512, 128>}, {pipeline_mode = #tpu.pipeline_mode<synchronous>, transform_indices = @transform_14, window_bounds = array<i64: 1, 128>}, {transform_indices = @transform_15, window_bounds = array<i64: 8, 128>}]} {
    %c0 = arith.constant 0 : index
    %c0_0 = arith.constant 0 : index
    %c0_1 = arith.constant 0 : index
    %0 = vector.load %arg6[%c0, %c0_0, %c0_1] : memref<1x1x256xbf16, #tpu.memory_space<vmem>>, vector<1x1x256xbf16>
    %1 = vector.shape_cast %0 : vector<1x1x256xbf16> to vector<1x256xbf16>
    %c0_2 = arith.constant 0 : index
    %c0_3 = arith.constant 0 : index
    %2 = vector.load %arg7[%c0_2, %c0_3] : memref<256x512xbf16, #tpu.memory_space<vmem>>, vector<256x512xbf16>
    %cst = arith.constant dense<0.000000e+00> : vector<1x512xf32>
    %3 = tpu.matmul %1, %2, %cst {dimension_numbers = #tpu.dot_dimension_numbers<[1], [0], [0], [1], [0, 0, 1, 1], [], []>} : vector<1x256xbf16>, vector<256x512xbf16>, vector<1x512xf32> -> vector<1x512xf32>
    %c0_4 = arith.constant 0 : index
    %c0_5 = arith.constant 0 : index
    %4 = vector.load %arg8[%c0_4, %c0_5] : memref<1x512xf32, #tpu.memory_space<vmem>>, vector<1x512xf32>
    %5 = arith.addf %3, %4 : vector<1x512xf32>
    %cst_6 = arith.constant 2.000000e-01 : f32
    %6 = vector.broadcast %cst_6 : f32 to vector<1x512xf32>
    %7 = arith.mulf %6, %5 : vector<1x512xf32>
    %8 = arith.maximumf %5, %7 : vector<1x512xf32>
    %9 = arith.truncf %8 : vector<1x512xf32> to vector<1x512xbf16>
    %c0_7 = arith.constant 0 : index
    %c0_8 = arith.constant 0 : index
    %10 = vector.load %arg9[%c0_7, %c0_8] : memref<512x128xbf16, #tpu.memory_space<vmem>>, vector<512x128xbf16>
    %cst_9 = arith.constant dense<0.000000e+00> : vector<1x128xf32>
    %11 = tpu.matmul %9, %10, %cst_9 {dimension_numbers = #tpu.dot_dimension_numbers<[1], [0], [0], [1], [0, 0, 1, 1], [], []>} : vector<1x512xbf16>, vector<512x128xbf16>, vector<1x128xf32> -> vector<1x128xf32>
    %c0_10 = arith.constant 0 : index
    %c0_11 = arith.constant 0 : index
    %12 = vector.load %arg10[%c0_10, %c0_11] : memref<1x128xf32, #tpu.memory_space<vmem>>, vector<1x128xf32>
    %13 = arith.addf %11, %12 : vector<1x128xf32>
    %c0_12 = arith.constant 0 : index
    %c0_13 = arith.constant 0 : index
    %c0_14 = arith.constant 0 : index
    %14 = vector.load %arg11[%c0_12, %c0_13, %c0_14] : memref<1x1x256xbf16, #tpu.memory_space<vmem>>, vector<1x1x256xbf16>
    %15 = vector.shape_cast %14 : vector<1x1x256xbf16> to vector<1x256xbf16>
    %c0_15 = arith.constant 0 : index
    %c0_16 = arith.constant 0 : index
    %16 = vector.load %arg12[%c0_15, %c0_16] : memref<256x512xbf16, #tpu.memory_space<vmem>>, vector<256x512xbf16>
    %cst_17 = arith.constant dense<0.000000e+00> : vector<1x512xf32>
    %17 = tpu.matmul %15, %16, %cst_17 {dimension_numbers = #tpu.dot_dimension_numbers<[1], [0], [0], [1], [0, 0, 1, 1], [], []>} : vector<1x256xbf16>, vector<256x512xbf16>, vector<1x512xf32> -> vector<1x512xf32>
    %c0_18 = arith.constant 0 : index
    %c0_19 = arith.constant 0 : index
    %18 = vector.load %arg13[%c0_18, %c0_19] : memref<1x512xf32, #tpu.memory_space<vmem>>, vector<1x512xf32>
    %19 = arith.addf %17, %18 : vector<1x512xf32>
    %cst_20 = arith.constant 2.000000e-01 : f32
    %20 = vector.broadcast %cst_20 : f32 to vector<1x512xf32>
    %21 = arith.mulf %20, %19 : vector<1x512xf32>
    %22 = arith.maximumf %19, %21 : vector<1x512xf32>
    %23 = arith.truncf %22 : vector<1x512xf32> to vector<1x512xbf16>
    %c0_21 = arith.constant 0 : index
    %c0_22 = arith.constant 0 : index
    %24 = vector.load %arg14[%c0_21, %c0_22] : memref<512x128xbf16, #tpu.memory_space<vmem>>, vector<512x128xbf16>
    %cst_23 = arith.constant dense<0.000000e+00> : vector<1x128xf32>
    %25 = tpu.matmul %23, %24, %cst_23 {dimension_numbers = #tpu.dot_dimension_numbers<[1], [0], [0], [1], [0, 0, 1, 1], [], []>} : vector<1x512xbf16>, vector<512x128xbf16>, vector<1x128xf32> -> vector<1x128xf32>
    %c0_24 = arith.constant 0 : index
    %c0_25 = arith.constant 0 : index
    %26 = vector.load %arg15[%c0_24, %c0_25] : memref<1x128xf32, #tpu.memory_space<vmem>>, vector<1x128xf32>
    %27 = arith.addf %25, %26 : vector<1x128xf32>
    %c0_26 = arith.constant 0 : index
    %c0_27 = arith.constant 0 : index
    %28 = vector.load %arg1[%c0_26, %c0_27] : memref<8x12xbf16, #tpu.memory_space<vmem>>, vector<8x12xbf16>
    %c0_28 = arith.constant 0 : index
    %c0_29 = arith.constant 0 : index
    %c0_30 = arith.constant 0 : index
    %29 = vector.load %arg2[%c0_28, %c0_29, %c0_30] : memref<1x12x64xbf16, #tpu.memory_space<vmem>>, vector<1x12x64xbf16>
    %30 = vector.shape_cast %29 : vector<1x12x64xbf16> to vector<12x64xbf16>
    %cst_31 = arith.constant dense<0.000000e+00> : vector<8x64xf32>
    %31 = tpu.matmul %28, %30, %cst_31 {dimension_numbers = #tpu.dot_dimension_numbers<[1], [0], [0], [1], [0, 0, 1, 1], [], []>} : vector<8x12xbf16>, vector<12x64xbf16>, vector<8x64xf32> -> vector<8x64xf32>
    %32 = arith.truncf %31 : vector<8x64xf32> to vector<8x64xbf16>
    %c0_32 = arith.constant 0 : index
    %c0_33 = arith.constant 0 : index
    %33 = vector.load %arg3[%c0_32, %c0_33] : memref<64x128xbf16, #tpu.memory_space<vmem>>, vector<64x128xbf16>
    %cst_34 = arith.constant dense<0.000000e+00> : vector<8x128xf32>
    %34 = tpu.matmul %32, %33, %cst_34 {dimension_numbers = #tpu.dot_dimension_numbers<[1], [0], [0], [1], [0, 0, 1, 1], [], []>} : vector<8x64xbf16>, vector<64x128xbf16>, vector<8x128xf32> -> vector<8x128xf32>
    %c0_35 = arith.constant 0 : index
    %c0_36 = arith.constant 0 : index
    %35 = vector.load %arg4[%c0_35, %c0_36] : memref<1x128xf32, #tpu.memory_space<vmem>>, vector<1x128xf32>
    %36 = vector.broadcast %35 : vector<1x128xf32> to vector<8x128xf32>
    %37 = arith.addf %34, %36 : vector<8x128xf32>
    %c0_37 = arith.constant 0 : index
    %c0_38 = arith.constant 0 : index
    %c0_39 = arith.constant 0 : index
    %38 = vector.load %arg5[%c0_37, %c0_38, %c0_39] : memref<1x1x128xf32, #tpu.memory_space<vmem>>, vector<1x1x128xf32>
    %39 = vector.shape_cast %38 : vector<1x1x128xf32> to vector<1x128xf32>
    %40 = vector.broadcast %39 : vector<1x128xf32> to vector<8x128xf32>
    %41 = arith.addf %37, %40 : vector<8x128xf32>
    %42 = vector.broadcast %13 : vector<1x128xf32> to vector<8x128xf32>
    %43 = arith.addf %41, %42 : vector<8x128xf32>
    %44 = vector.broadcast %27 : vector<1x128xf32> to vector<8x128xf32>
    %45 = arith.addf %43, %44 : vector<8x128xf32>
    %46 = arith.truncf %45 : vector<8x128xf32> to vector<8x128xbf16>
    %c0_40 = arith.constant 0 : index
    %c0_41 = arith.constant 0 : index
    %47 = vector.load %arg16[%c0_40, %c0_41] : memref<8x128xbf16, #tpu.memory_space<vmem>>, vector<8x128xbf16>
    tpu.vector_store %arg16[%c0_40, %c0_41], %46 {strides = array<i32>} : memref<8x128xbf16, #tpu.memory_space<vmem>>, vector<8x128xbf16>,
    return
  }
  func.func @transform_0(%arg0: i32) -> (i32, i32) {
    %c0_i32 = arith.constant 0 : i32
    %c0_i32_0 = arith.constant 0 : i32
    %c0_i32_1 = arith.constant 0 : i32
    return %c0_i32, %c0_i32_0 : i32, i32
  }
  func.func @transform_1(%arg0: i32) -> (i32, i32, i32) {
    %c0_i32 = arith.constant 0 : i32
    %c0_i32_0 = arith.constant 0 : i32
    %c0_i32_1 = arith.constant 0 : i32
    return %arg0, %c0_i32, %c0_i32_0 : i32, i32, i32
  }
  func.func @transform_2(%arg0: i32) -> (i32, i32) {
    %c0_i32 = arith.constant 0 : i32
    %c0_i32_0 = arith.constant 0 : i32
    %c0_i32_1 = arith.constant 0 : i32
    return %c0_i32, %c0_i32_0 : i32, i32
  }
  func.func @transform_3(%arg0: i32) -> (i32, i32) {
    %c0_i32 = arith.constant 0 : i32
    %c0_i32_0 = arith.constant 0 : i32
    %c0_i32_1 = arith.constant 0 : i32
    return %c0_i32, %c0_i32_0 : i32, i32
  }
  func.func @transform_4(%arg0: i32) -> (i32, i32, i32) {
    %c0_i32 = arith.constant 0 : i32
    %c0_i32_0 = arith.constant 0 : i32
    %c0_i32_1 = arith.constant 0 : i32
    return %arg0, %c0_i32, %c0_i32_0 : i32, i32, i32
  }
  func.func @transform_5(%arg0: i32) -> (i32, i32, i32) {
    %c0_i32 = arith.constant 0 : i32
    %c0_i32_0 = arith.constant 0 : i32
    %c0_i32_1 = arith.constant 0 : i32
    return %arg0, %c0_i32, %c0_i32_0 : i32, i32, i32
  }
  func.func @transform_6(%arg0: i32) -> (i32, i32) {
    %c0_i32 = arith.constant 0 : i32
    %c0_i32_0 = arith.constant 0 : i32
    %c0_i32_1 = arith.constant 0 : i32
    return %c0_i32, %c0_i32_0 : i32, i32
  }
  func.func @transform_7(%arg0: i32) -> (i32, i32) {
    %c0_i32 = arith.constant 0 : i32
    %c0_i32_0 = arith.constant 0 : i32
    %c0_i32_1 = arith.constant 0 : i32
    return %c0_i32, %c0_i32_0 : i32, i32
  }
  func.func @transform_8(%arg0: i32) -> (i32, i32) {
    %c0_i32 = arith.constant 0 : i32
    %c0_i32_0 = arith.constant 0 : i32
    %c0_i32_1 = arith.constant 0 : i32
    return %c0_i32, %c0_i32_0 : i32, i32
  }
  func.func @transform_9(%arg0: i32) -> (i32, i32) {
    %c0_i32 = arith.constant 0 : i32
    %c0_i32_0 = arith.constant 0 : i32
    %c0_i32_1 = arith.constant 0 : i32
    return %c0_i32, %c0_i32_0 : i32, i32
  }
  func.func @transform_10(%arg0: i32) -> (i32, i32, i32) {
    %c0_i32 = arith.constant 0 : i32
    %c0_i32_0 = arith.constant 0 : i32
    %c0_i32_1 = arith.constant 0 : i32
    return %arg0, %c0_i32, %c0_i32_0 : i32, i32, i32
  }
  func.func @transform_11(%arg0: i32) -> (i32, i32) {
    %c0_i32 = arith.constant 0 : i32
    %c0_i32_0 = arith.constant 0 : i32
    %c0_i32_1 = arith.constant 0 : i32
    return %c0_i32, %c0_i32_0 : i32, i32
  }
  func.func @transform_12(%arg0: i32) -> (i32, i32) {
    %c0_i32 = arith.constant 0 : i32
    %c0_i32_0 = arith.constant 0 : i32
    %c0_i32_1 = arith.constant 0 : i32
    return %c0_i32, %c0_i32_0 : i32, i32
  }
  func.func @transform_13(%arg0: i32) -> (i32, i32) {
    %c0_i32 = arith.constant 0 : i32
    %c0_i32_0 = arith.constant 0 : i32
    %c0_i32_1 = arith.constant 0 : i32
    return %c0_i32, %c0_i32_0 : i32, i32
  }
  func.func @transform_14(%arg0: i32) -> (i32, i32) {
    %c0_i32 = arith.constant 0 : i32
    %c0_i32_0 = arith.constant 0 : i32
    %c0_i32_1 = arith.constant 0 : i32
    return %c0_i32, %c0_i32_0 : i32, i32
  }
  func.func @transform_15(%arg0: i32) -> (i32, i32) {
    %c0_i32 = arith.constant 0 : i32
    %c0_i32_0 = arith.constant 0 : i32
    return %c0_i32, %arg0 : i32, i32
  }
}

</mosaic_0001>

<bundles_post_ra>
// kernel: tpu_custom_call.1
= control target key start
LH: loop header
LB: loop body
LE: loop exit
PB: predicated region body
PF: predicated region fallthrough
CT: control target
= control target key end

     0   :  { %s3922_s0 = inlined_call_operand.vmem [shape: bf16[8,12], index: 0, kind: input, shape index: {}]   ;;  %s3923_s1 = inlined_call_operand.vmem [shape: bf16[2,12,64], index: 1, kind: input, shape index: {}]   ;;  %s3924_s2 = inlined_call_operand.vmem [shape: bf16[64,128], index: 2, kind: input, shape index: {}]   ;;  %s3925_s3 = inlined_call_operand.vmem [shape: f32[1,128], index: 3, kind: input, shape index: {}]   ;;  %s3926_s4 = inlined_call_operand.vmem [shape: f32[2,1,128], index: 4, kind: input, shape index: {}]   ;;  %s3927_s5 = inlined_call_operand.vmem [shape: bf16[2,1,256], index: 5, kind: input, shape index: {}]   ;;  %s3928_s6 = inlined_call_operand.hbm [shape: bf16[256,512], index: 6, kind: input, shape index: {}]   ;;  %s3929_s7 = inlined_call_operand.vmem [shape: f32[1,512], index: 7, kind: input, shape index: {}]   ;;  %s3930_s8 = inlined_call_operand.hbm [shape: bf16[512,128], index: 8, kind: input, shape index: {}]   ;;  %s3931_s9 = inlined_call_operand.vmem [shape: f32[1,128], index: 9, kind: input, shape index: {}]   ;;  %s3932_s10 = inlined_call_operand.vmem [shape: bf16[2,1,256], index: 10, kind: input, shape index: {}]   ;;  %s3933_s11 = inlined_call_operand.hbm [shape: bf16[256,512], index: 11, kind: input, shape index: {}]   ;;  %s3934_s12 = inlined_call_operand.vmem [shape: f32[1,512], index: 12, kind: input, shape index: {}]   ;;  %s3935_s13 = inlined_call_operand.hbm [shape: bf16[512,128], index: 13, kind: input, shape index: {}]   ;;  %s3936_s14 = inlined_call_operand.vmem [shape: f32[1,128], index: 14, kind: input, shape index: {}]   ;;  %s3937_s15 = inlined_call_operand.hbm [shape: bf16[8,256], index: 15, kind: output, shape index: {}]  }
   0x1   :  { %3952 = sst [smem:[#allocation22_spill]] %s3925_s3 }
   0x2   :  { %3953 = sst [smem:[#allocation23_spill]] %s3926_s4 }
   0x3   :  { %3954 = sst [smem:[#allocation24_spill]] %s3930_s8 }
   0x4   :  { %3955 = sst [smem:[#allocation25_spill]] %s3937_s15 }
   0x5   :  { %20 = vsyncpa [#allocation3], 0 }
   0x6   :  { %21 = vsyncpa [#allocation6], 0 }
   0x7   :  { %22 = vsyncpa [#allocation9], 0 }
   0x8   :  { %23 = vsyncpa [#allocation4], 0 }
   0x9   :  { %25 = vsyncpa [#allocation4 + $0x1], 0  ;;  %s3600_s18 = smov 0   ;;  %s3602_s19 = smov 0  }
   0xa   :  { %s3604_s20 = smov 0   ;;  %s3606_s21 = smov 0  }
   0xb LB: > { %3956 = sst [smem:[#allocation15_spill]] %s3494_s18  ;;  %s3621_s22 = sadd.s32 4294967295, %s3506_s21   ;;  %s3506_s21 = sphi %s3606_s21, %s3987_s21   ;;  %s3502_s20 = sphi %s3604_s20, %s3989_s20   ;;  %s3498_s19 = sphi %s3602_s19, %s3991_s19   ;;  %s3494_s18 = sphi %s3600_s18, %s3990_s18  }
   0xc   : > { %3957 = sst [smem:[#allocation16_spill]] %s3502_s20  ;;  %s2634_s23 = sadd.s32 4294967294, %s3506_s21  }
   0xd   : > { %3958 = sst [smem:[#allocation17_spill]] %s3506_s21  ;;  %s3625_s24 = sadd.s32 1, %s3506_s21  }
   0xe   : > { %3959 = sst [smem:[#allocation18_spill]] %s3625_s24  ;;  %s373_s25 = sadd.s32 1, %s3502_s20 }
   0xf   : > { %s370_s26 = ssub.s32 %s3506_s21, %s3625_s24  ;;  %p383_p0 = scmp.ne.s32.totalorder %s3502_s20, %s3498_s19 }
  0x10   : > { %p371_p1 = scmp.eq.s32.totalorder %s370_s26, 0  ;;  %p384_p2 = scmp.eq.s32.totalorder %s3621_s22, 1 }
  0x11   : > { %p389_p3 = scmp.ne.s32.totalorder %s3498_s19, %s3494_s18  ;;  %p390_p4 = scmp.eq.s32.totalorder %s2634_s23, 1 }
  0x12   : > { %s3636_s27 = scalar_select %p371_p1, %s3502_s20, %s373_s25  }
  0x13   : > { %p3638_p5 = por %p384_p2, %p383_p0  ;;  %p3642_p6 = por %p390_p4, %p389_p3 }
  0x14   : > { %3960 = sst [smem:[#allocation19_spill]] %s3636_s27  ;;  %p2635_p7 = scmp.ge.s32.totalorder %s3506_s21, 1 }
  0x15   : > { %s3961_s28 = scalar_select %p3638_p5, 1, 0 }
  0x16   : > { %s3963_s29 = scalar_select %p3642_p6, 1, 0 }
  0x17   : > { %3962 = sst [smem:[#allocation20_spill]] %s3961_s28  ;;  %p397_p8 = scmp.lt.s32.totalorder %s3506_s21, 3 }
  0x18   : > { %3964 = sst [smem:[#allocation21_spill]] %s3963_s29  ;;  %p3944_p9 = scmp.eq.s32.totalorder %s3621_s22, 0 }
  0x19   : > { %p3649_p10 = pnand %p2635_p7, %p397_p8  ;;  %s3508_s16 = smov [#allocation5]  }
  0x1a   : > { %s434_s17 = sshll.u32 %s3508_s16, 4  ;;  %s3509_s25 = smov [#allocation2]   ;;  %s435_s17 = int_to_ptr.vmem [resolvable:$true] %s434_s17 }
  0x1b   : > { %s3965_s30 = scalar_select %p3649_p10, 1, 0 }
  0x1c   : > { %p2990_p11 = pneg %p3649_p10  ;;  %s418_s26 = sshll.u32 %s3509_s25, 4  ;;  %s3661_s26 = int_to_ptr.vmem [resolvable:$true] %s418_s26 }
  0x1d   : > { %s3967_s8 = sld [smem:[#allocation24_spill]] }
  0x1e   : > { %p3657_p12 = pnand %p3944_p9, %p2990_p11 }
  0x20   : > { %p3671_p0 = pneg %p3657_p12 }
  0x23   : > { %s3320_s24 = scalar_lea.hbm %s3967_s8, 4096 }
  0x24   : > { %p3321_p13 = scmp.ne.s32.totalorder %s3967_s8, %s3320_s24  ;;  %p3327_p3 = scmp.lt.u32.totalorder %s3320_s24, %s3967_s8 }
  0x26   : > { %p3323_p1 = pnand %p3671_p0, %p3321_p13 }
  0x28   : > { %p3324_p2 = pneg %p3323_p1 }
  0x2a   : > { %p3329_p4 = pnand %p3327_p3, %p3324_p2 }
  0x2c   : > { %3332 = shalt.err (!%p3329_p4)
}
  0x2d   : > { %s3333_s20 = scalar_lea.vmem %s435_s17, 4096  ;;  %p3341_p9 = scmp.lt.s32.totalorder %s435_s17, %s435_s17 }
  0x2e   : > { %p3334_p7 = scmp.ne.s32.totalorder %s435_s17, %s3333_s20  ;;  %p3342_p6 = scmp.lt.s32.totalorder %s3333_s20, %s3333_s20 }
  0x30   : > { %p3336_p8 = pnand %p3334_p7, %p3671_p0  ;;  %p3343_p5 = por %p3342_p6, %p3341_p9 }
  0x32   : > { %p3337_p11 = pneg %p3336_p8 }
  0x34   : > { %p3344_p10 = pnand %p3343_p5, %p3337_p11 }
  0x36   : > { %3347 = shalt.err (!%p3344_p10)
}
  0x37   : > { %s3950_s18 = smov 64   ;;  %s3951_s27 = smov 4  }
  0x38   : > { %2996 = dma.hbm_to_vmem [thread:$0]  (!%p3657_p12), %s3967_s8, 4096, %s435_s17, [#allocation6], %s3950_s18, %s3950_s18, %s3951_s27  }
  0x39   : > { %s3348_s15 = scalar_lea.hbm %s3928_s6, 8192 }
  0x3a   : > { %p3349_p5 = scmp.ne.s32.totalorder %s3928_s6, %s3348_s15  ;;  %p3355_p10 = scmp.lt.u32.totalorder %s3348_s15, %s3928_s6 }
  0x3c   : > { %p3351_p6 = pnand %p3349_p5, %p3671_p0 }
  0x3e   : > { %p3352_p9 = pneg %p3351_p6 }
  0x40   : > { %p3357_p13 = pnand %p3355_p10, %p3352_p9 }
  0x42   : > { %3360 = shalt.err (!%p3357_p13)
}
  0x43   : > { %s3361_s17 = scalar_lea.vmem %s3661_s26, 8192  ;;  %p3369_p4 = scmp.lt.s32.totalorder %s3661_s26, %s3661_s26 }
  0x44   : > { %p3362_p1 = scmp.ne.s32.totalorder %s3661_s26, %s3361_s17  ;;  %p3370_p7 = scmp.lt.s32.totalorder %s3361_s17, %s3361_s17 }
  0x46   : > { %p3364_p2 = pnand %p3362_p1, %p3671_p0  ;;  %p3371_p8 = por %p3370_p7, %p3369_p4 }
  0x48   : > { %p3365_p3 = pneg %p3364_p2 }
  0x4a   : > { %p3372_p11 = pnand %p3371_p8, %p3365_p3 }
  0x4c   : > { %3375 = shalt.err (!%p3372_p11)
}
  0x4d   : > { %s3512_s28 = smov 256   ;;  %s3513_s3 = smov 16  }
  0x4e   : > { %2993 = dma.hbm_to_vmem [thread:$0]  (!%p3657_p12), %s3928_s6, 8192, %s3661_s26, [#allocation3], %s3512_s28, %s3512_s28, %s3513_s3  }
  0x4f   : > { %s3514_s21 = smov [#allocation7]   ;;  %s3515_s29 = smov [#allocation8]  }
  0x50   : > { %s450_s24 = sshll.u32 %s3514_s21, 4  ;;  %s466_s25 = sshll.u32 %s3515_s29, 4  ;;  %s451_s24 = int_to_ptr.vmem [resolvable:$true] %s450_s24  ;;  %s3713_s25 = int_to_ptr.vmem [resolvable:$true] %s466_s25 }
  0x51   : > { %s3376_s18 = scalar_lea.hbm %s3933_s11, 8192 }
  0x52   : > { %p3377_p5 = scmp.ne.s32.totalorder %s3933_s11, %s3376_s18  ;;  %p3383_p10 = scmp.lt.u32.totalorder %s3376_s18, %s3933_s11 }
  0x54   : > { %p3379_p6 = pnand %p3377_p5, %p3671_p0 }
  0x56   : > { %p3380_p9 = pneg %p3379_p6 }
  0x58   : > { %p3385_p13 = pnand %p3383_p10, %p3380_p9 }
  0x5a   : > { %3388 = shalt.err (!%p3385_p13)
}
  0x5b   : > { %s3389_s15 = scalar_lea.vmem %s451_s24, 8192  ;;  %p3397_p4 = scmp.lt.s32.totalorder %s451_s24, %s451_s24 }
  0x5c   : > { %p3390_p1 = scmp.ne.s32.totalorder %s451_s24, %s3389_s15  ;;  %p3398_p7 = scmp.lt.s32.totalorder %s3389_s15, %s3389_s15 }
  0x5e   : > { %p3392_p2 = pnand %p3390_p1, %p3671_p0  ;;  %p3399_p8 = por %p3398_p7, %p3397_p4 }
  0x60   : > { %p3393_p3 = pneg %p3392_p2 }
  0x62   : > { %p3400_p11 = pnand %p3399_p8, %p3393_p3 }
  0x64   : > { %3403 = shalt.err (!%p3400_p11)
}
  0x65   : > { %2999 = dma.hbm_to_vmem [thread:$0]  (!%p3657_p12), %s3933_s11, 8192, %s451_s24, [#allocation6], %s3512_s28, %s3512_s28, %s3513_s3  }
  0x66   : > { %s3404_s29 = scalar_lea.hbm %s3935_s13, 4096 }
  0x67   : > { %p3405_p5 = scmp.ne.s32.totalorder %s3935_s13, %s3404_s29  ;;  %p3411_p10 = scmp.lt.u32.totalorder %s3404_s29, %s3935_s13 }
  0x69   : > { %p3407_p6 = pnand %p3405_p5, %p3671_p0 }
  0x6b   : > { %p3408_p9 = pneg %p3407_p6 }
  0x6d   : > { %p3413_p13 = pnand %p3411_p10, %p3408_p9 }
  0x6f   : > { %3416 = shalt.err (!%p3413_p13)
}
  0x70   : > { %s3417_s28 = scalar_lea.vmem %s3713_s25, 4096  ;;  %p3425_p4 = scmp.lt.s32.totalorder %s3713_s25, %s3713_s25 }
  0x71   : > { %p3418_p1 = scmp.ne.s32.totalorder %s3713_s25, %s3417_s28  ;;  %p3426_p7 = scmp.lt.s32.totalorder %s3417_s28, %s3417_s28 }
  0x73   : > { %p3420_p2 = pnand %p3418_p1, %p3671_p0  ;;  %p3427_p8 = por %p3426_p7, %p3425_p4 }
  0x75   : > { %p3421_p3 = pneg %p3420_p2 }
  0x77   : > { %p3428_p11 = pnand %p3427_p8, %p3421_p3 }
  0x79   : > { %3431 = shalt.err (!%p3428_p11)
}
  0x7a   : > { %s3969_s3 = smov 4   ;;  %s3970_s24 = smov 64  }
  0x7b   : > { %3002 = dma.hbm_to_vmem [thread:$0]  (!%p3657_p12), %s3935_s13, 4096, %s3713_s25, [#allocation9], %s3970_s24, %s3970_s24, %s3969_s3  }
  0x7c   : > { %p3971_p5 = scmp.ne.s32.totalorder %s3965_s30, 0 }
  0x7d   : > { %p3972_p0 = scmp.eq.s32.totalorder (!%p3971_p5), %s3621_s22, 0 }
  0x7e   : > { %513 = sbr.rel (%p3971_p5) target bundleno = 1171 (0x493), region = 80 }
  0x85   : > { %3477 = dma.done.wait (%p3972_p0), [#allocation3], 8192   ;;  %p3973_p6 = pmov %p3972_p0 }
  0x86   : > { %p3974_p9 = pmov %p3972_p0 }
  0x87   : > { %3479 = vsyncadd (%p3973_p6), [#allocation3], 4294959104 }
  0x88   : > { %3481 = dma.done.wait (%p3974_p9), [#allocation6], 12288   ;;  %p3975_p10 = pmov %p3972_p0 }
  0x89   : > { %p3976_p13 = pmov %p3972_p0 }
  0x8a   : > { %3483 = vsyncadd (%p3975_p10), [#allocation6], 4294955008 }
  0x8b   : > { %3485 = dma.done.wait (%p3976_p13), [#allocation9], 4096   ;;  %p3977_p12 = pmov %p3972_p0 }
  0x8c   : > { %v3059_v0 = vld [vmem:[#allocation2 + $0x4] ss:$16 sps:$4 sm:$0xff]   ;;  %v3061_v1 = vld [vmem:[#allocation2] ss:$16 sps:$4 sm:$0xff]   ;;  %v3062_v2 = vld [vmem:[#allocation2 + $0xc] ss:$16 sps:$4 sm:$0xff]   ;;  %v679_v39 = vlaneseq }
  0x8d   : > { %3487 = vsyncadd (%p3977_p12), [#allocation9], 4294963200  ;;  %1033 = vmatprep.subr.bf16.mxu0 %v3059_v0  ;;  %v3064_v3 = vld [vmem:[#allocation2 + $0x8] ss:$16 sps:$4 sm:$0xff]   ;;  %v3065_v4 = vld [vmem:[#allocation2 + $0x24] ss:$16 sps:$4 sm:$0xff]   ;;  %1074 = vmatprep.subr.bf16.mxu1 %v3062_v2 }
  0x8e   : > { %1034 = vmatpush1.bf16.msra.mxu0 %v3061_v1  ;;  %v3067_v5 = vld [vmem:[#allocation2 + $0x20] ss:$16 sps:$4 sm:$0xff]   ;;  %v3068_v6 = vld [vmem:[#allocation2 + $0x2c] ss:$16 sps:$4 sm:$0xff]   ;;  %1075 = vmatpush1.bf16.msra.mxu1 %v3064_v3  ;;  %v3070_v7 = vld [vmem:[#allocation2 + $0x28] ss:$16 sps:$4 sm:$0xff]  }
  0x8f   : > { %1035 = vmatprep.subr.bf16.mxu0 %v3065_v4  ;;  %1076 = vmatprep.subr.bf16.mxu1 %v3068_v6  ;;  %v3071_v8 = vld [vmem:[#allocation2 + $0x44] ss:$16 sps:$4 sm:$0xff]   ;;  %v3073_v9 = vld [vmem:[#allocation2 + $0x40] ss:$16 sps:$4 sm:$0xff]   ;;  %v3074_v10 = vld [vmem:[#allocation2 + $0x4c] ss:$16 sps:$4 sm:$0xff]  }
  0x90   : > { %v3077_v11 = vld [vmem:[#allocation2 + $0x64] ss:$16 sps:$4 sm:$0xff]   ;;  %v3076_v12 = vld [vmem:[#allocation2 + $0x48] ss:$16 sps:$4 sm:$0xff]   ;;  %v3080_v13 = vld [vmem:[#allocation2 + $0x6c] ss:$16 sps:$4 sm:$0xff]  }
  0x91   : > { %v3079_v14 = vld [vmem:[#allocation2 + $0x60] ss:$16 sps:$4 sm:$0xff]   ;;  %v3083_v15 = vld [vmem:[#allocation2 + $0x84] ss:$16 sps:$4 sm:$0xff]   ;;  %v3082_v16 = vld [vmem:[#allocation2 + $0x68] ss:$16 sps:$4 sm:$0xff]  }
  0x92   : > { %1036 = vmatpush1.bf16.msra.mxu0 %v3067_v5  ;;  %1077 = vmatpush1.bf16.msra.mxu1 %v3070_v7  ;;  %v3086_v17 = vld [vmem:[#allocation2 + $0x8c] ss:$16 sps:$4 sm:$0xff]   ;;  %v3085_v18 = vld [vmem:[#allocation2 + $0x80] ss:$16 sps:$4 sm:$0xff]   ;;  %v3089_v19 = vld [vmem:[#allocation2 + $0xa4] ss:$16 sps:$4 sm:$0xff]  }
  0x93   : > { %1037 = vmatprep.subr.bf16.mxu0 %v3071_v8  ;;  %1078 = vmatprep.subr.bf16.mxu1 %v3074_v10  ;;  %v3088_v20 = vld [vmem:[#allocation2 + $0x88] ss:$16 sps:$4 sm:$0xff]   ;;  %v3092_v21 = vld [vmem:[#allocation2 + $0xac] ss:$16 sps:$4 sm:$0xff]   ;;  %v3091_v22 = vld [vmem:[#allocation2 + $0xa0] ss:$16 sps:$4 sm:$0xff]  }
  0x94   : > { %v3095_v23 = vld [vmem:[#allocation2 + $0xc4] ss:$16 sps:$4 sm:$0xff]   ;;  %v3094_v24 = vld [vmem:[#allocation2 + $0xa8] ss:$16 sps:$4 sm:$0xff]   ;;  %v3098_v25 = vld [vmem:[#allocation2 + $0xcc] ss:$16 sps:$4 sm:$0xff]  }
  0x95   : > { %v3097_v26 = vld [vmem:[#allocation2 + $0xc0] ss:$16 sps:$4 sm:$0xff]   ;;  %v3101_v27 = vld [vmem:[#allocation2 + $0xe4] ss:$16 sps:$4 sm:$0xff]   ;;  %v3100_v28 = vld [vmem:[#allocation2 + $0xc8] ss:$16 sps:$4 sm:$0xff]  }
  0x96   : > { %1038 = vmatpush1.bf16.msra.mxu0 %v3073_v9  ;;  %1079 = vmatpush1.bf16.msra.mxu1 %v3076_v12  ;;  %v3104_v29 = vld [vmem:[#allocation2 + $0xec] ss:$16 sps:$4 sm:$0xff]   ;;  %v3103_v30 = vld [vmem:[#allocation2 + $0xe0] ss:$16 sps:$4 sm:$0xff]   ;;  %v3107_v31 = vld [vmem:[#allocation2 + $0x104] ss:$16 sps:$4 sm:$0xff]  }
  0x97   : > { %1039 = vmatprep.subr.bf16.mxu0 %v3077_v11  ;;  %1080 = vmatprep.subr.bf16.mxu1 %v3080_v13  ;;  %p584_p1 = scmp.lt.s32.totalorder %s3621_s22, 1  ;;  %v3106_v32 = vld [vmem:[#allocation2 + $0xe8] ss:$16 sps:$4 sm:$0xff]   ;;  %v3110_v33 = vld [vmem:[#allocation2 + $0x10c] ss:$16 sps:$4 sm:$0xff]   ;;  %v3778_v45 = vshrl.u32 %v679_v39, 7 }
  0x98   : > { %v3109_v34 = vld [vmem:[#allocation2 + $0x100] ss:$16 sps:$4 sm:$0xff]   ;;  %v3113_v35 = vld [vmem:[#allocation2 + $0x124] ss:$16 sps:$4 sm:$0xff]   ;;  %v3112_v36 = vld [vmem:[#allocation2 + $0x108] ss:$16 sps:$4 sm:$0xff]  }
  0x99   : > { %s3775_s30 = scalar_select %p584_p1, %s3621_s22, 1  ;;  %v3516_v37 = vmov 1966171168   ;;  %v3116_v40 = vld [vmem:[#allocation2 + $0x12c] ss:$16 sps:$4 sm:$0xff]   ;;  %v3155_v9 = vld [vmem:[#allocation5 + $0x40] sm:$0xff]  }
  0x9a   : > { %1040 = vmatpush1.bf16.msra.mxu0 %v3079_v14  ;;  %1081 = vmatpush1.bf16.msra.mxu1 %v3082_v16  ;;  %v677_v38 = vunpack.c.l.s4 %v3516_v37  ;;  %v3115_v41 = vld [vmem:[#allocation2 + $0x120] ss:$16 sps:$4 sm:$0xff]   ;;  %v3119_v42 = vld [vmem:[#allocation2 + $0x144] ss:$16 sps:$4 sm:$0xff]   ;;  %v3118_v43 = vld [vmem:[#allocation2 + $0x128] ss:$16 sps:$4 sm:$0xff]  }
  0x9b   : > { %1041 = vmatprep.subr.bf16.mxu0 %v3083_v15  ;;  %1082 = vmatprep.subr.bf16.mxu1 %v3086_v17  ;;  %s2649_s23 = sshll.u32 %s3775_s30, 1  ;;  %v3122_v46 = vld [vmem:[#allocation2 + $0x14c] ss:$16 sps:$4 sm:$0xff]   ;;  %v3121_v47 = vld [vmem:[#allocation2 + $0x140] ss:$16 sps:$4 sm:$0xff]   ;;  %s2858_s4 = sshll.u32 %s3775_s30, 3 }
  0x9c   : > { %v678_v44 = vunpack.c.0.s8 %v677_v38  ;;  %v3124_v48 = vld [vmem:[#allocation2 + $0x148] ss:$16 sps:$4 sm:$0xff]   ;;  %s595_s27 = scalar_lea.vmem %s3927_s5, %s2649_s23  ;;  %v3125_v49 = vld [vmem:[#allocation2 + $0x164] ss:$16 sps:$4 sm:$0xff]   ;;  %v3127_v50 = vld [vmem:[#allocation2 + $0x160] ss:$16 sps:$4 sm:$0xff]   ;;  %s599_s17 = scalar_lea.vmem %s3932_s10, %s2649_s23 }
  0x9d   : > { %v3128_v52 = vld [vmem:[#allocation2 + $0x16c] ss:$16 sps:$4 sm:$0xff]   ;;  %v2651_v53 = vld.sshfl [vmem:[%s595_s27] sm:$0x11 pattern:$0x75316420]  ;;  %s3824_s3 = scalar_lea.vmem %s3923_s1, %s2858_s4 }
  0x9e   : > { %1042 = vmatpush1.bf16.msra.mxu0 %v3085_v18  ;;  %1083 = vmatpush1.bf16.msra.mxu1 %v3088_v20  ;;  %v3786_v51 = vsub.s32 %v678_v44, %v3778_v45  ;;  %v3130_v54 = vld [vmem:[#allocation2 + $0x168] ss:$16 sps:$4 sm:$0xff]   ;;  %v675_v55 = vcombine.high %v2651_v53, %v2651_v53  ;;  %v3131_v56 = vld [vmem:[#allocation2 + $0x184] ss:$16 sps:$4 sm:$0xff]   ;;  %v3133_v57 = vld [vmem:[#allocation2 + $0x180] ss:$16 sps:$4 sm:$0xff]  }
  0x9f   : > { %1043 = vmatprep.subr.bf16.mxu0 %v3089_v19  ;;  %1084 = vmatprep.subr.bf16.mxu1 %v3092_v21  ;;  %v3134_v59 = vld [vmem:[#allocation2 + $0x18c] ss:$16 sps:$4 sm:$0xff]   ;;  %v3136_v60 = vld [vmem:[#allocation2 + $0x188] ss:$16 sps:$4 sm:$0xff]   ;;  %v3137_v61 = vld [vmem:[#allocation2 + $0x1a4] ss:$16 sps:$4 sm:$0xff]  }
  0xa0   : > { %v689_v58 = vrot.slane %v675_v55, %v3786_v51  ;;  %v3139_v62 = vld [vmem:[#allocation2 + $0x1a0] ss:$16 sps:$4 sm:$0xff]   ;;  %v3140_v63 = vld [vmem:[#allocation2 + $0x1ac] ss:$16 sps:$4 sm:$0xff]   ;;  %v3142_v0 = vld [vmem:[#allocation2 + $0x1a8] ss:$16 sps:$4 sm:$0xff]   ;;  %v682_v11 = vrot.slane %v2651_v53, %v3786_v51 }
  0xa1   : > { %v3143_v1 = vld [vmem:[#allocation2 + $0x1c4] ss:$16 sps:$4 sm:$0xff]   ;;  %v3145_v2 = vld [vmem:[#allocation2 + $0x1c0] ss:$16 sps:$4 sm:$0xff]   ;;  %v3146_v3 = vld [vmem:[#allocation2 + $0x1cc] ss:$16 sps:$4 sm:$0xff]  }
  0xa2   : > { %1044 = vmatpush1.bf16.msra.mxu0 %v3091_v22  ;;  %1085 = vmatpush1.bf16.msra.mxu1 %v3094_v24  ;;  %v3148_v4 = vld [vmem:[#allocation2 + $0x1c8] ss:$16 sps:$4 sm:$0xff]   ;;  %v3149_v5 = vld [vmem:[#allocation2 + $0x1e4] ss:$16 sps:$4 sm:$0xff]   ;;  %v3151_v6 = vld [vmem:[#allocation2 + $0x1e0] ss:$16 sps:$4 sm:$0xff]  }
  0xa3   : > { %1045 = vmatprep.subr.bf16.mxu0 %v3095_v23  ;;  %1086 = vmatprep.subr.bf16.mxu1 %v3098_v25  ;;  %v3152_v7 = vld [vmem:[#allocation2 + $0x1ec] ss:$16 sps:$4 sm:$0xff]   ;;  %v3154_v8 = vld [vmem:[#allocation2 + $0x1e8] ss:$16 sps:$4 sm:$0xff]   ;;  %v3156_v10 = vld [vmem:[#allocation5] sm:$0xff]   ;;  %v3791_v44 = vsub.s32 0, %v3778_v45 }
  0xa4   : > { %1065 = vmatprep.mubr.bf16.mxu0 %v689_v58  ;;  %1106 = vmatprep.mubr.bf16.mxu1 %v689_v58  ;;  %v3157_v12 = vld [vmem:[#allocation5 + $0xc0] sm:$0xff]   ;;  %v3159_v14 = vld [vmem:[#allocation5 + $0x48] sm:$0xff]   ;;  %v3163_v17 = vld [vmem:[#allocation5 + $0x50] sm:$0xff]   ;;  %vm2339_vm0 = vcmask 1045504   ;;  %vm3518_vm1 = vmmov 0   ;;  %vm2335_vm2 = vcmask 97280  }
  0xa5   : > { %v3158_v13 = vld [vmem:[#allocation5 + $0x80] sm:$0xff]   ;;  %v3160_v15 = vld [vmem:[#allocation5 + $0x8] sm:$0xff]   ;;  %v3165_v19 = vld [vmem:[#allocation5 + $0xd0] sm:$0xff]   ;;  %vm2423_vm3 = vcmask 523264   ;;  %s3978_s8 = sld [smem:[#allocation23_spill]]  ;;  %s581_s16 = sand.u32 1, %s3498_s19  }
  0xa6   : > { %1046 = vmatpush1.bf16.msra.mxu0 %v3097_v26  ;;  %1087 = vmatpush1.bf16.msra.mxu1 %v3100_v28  ;;  %v3161_v16 = vld [vmem:[#allocation5 + $0xc8] sm:$0xff]   ;;  %v3164_v20 = vld [vmem:[#allocation5 + $0x10] sm:$0xff]   ;;  %v3167_v21 = vld [vmem:[#allocation5 + $0x58] sm:$0xff]   ;;  %s3979_s18 = sld [smem:[#allocation22_spill]]  ;;  %s2646_s21 = sshll.u32 %s581_s16, 2 }
  0xa7   : > { %1047 = vmatprep.subr.bf16.mxu0 %v3101_v27  ;;  %1088 = vmatprep.subr.bf16.mxu1 %v3104_v29  ;;  %v3162_v18 = vld [vmem:[#allocation5 + $0x88] sm:$0xff]   ;;  %v3166_v22 = vld [vmem:[#allocation5 + $0x90] sm:$0xff]   ;;  %v3169_v23 = vld [vmem:[#allocation5 + $0xd8] sm:$0xff]   ;;  %s3980_s29 = sld [smem:[#allocation20_spill]]  ;;  %s583_s20 = scalar_lea.vmem [#allocation10], %s2646_s21 }
  0xa8   : > { %v3168_v24 = vld [vmem:[#allocation5 + $0x18] sm:$0xff]   ;;  %v3171_v25 = vld [vmem:[#allocation5 + $0x60] sm:$0xff]   ;;  %v3175_v29 = vld [vmem:[#allocation5 + $0x68] sm:$0xff]   ;;  %s3981_s28 = sld [smem:[#allocation25_spill]]  ;;  %s2488_s24 = scalar_lea.sflag [#allocation4], %s581_s16 }
  0xa9   : > { %v3170_v26 = vld [vmem:[#allocation5 + $0x98] sm:$0xff]   ;;  %v3173_v27 = vld [vmem:[#allocation5 + $0xe0] sm:$0xff]   ;;  %v3182_v37 = vld [vmem:[#allocation5 + $0xb0] sm:$0xff]  }
  0xaa   : > { %1048 = vmatpush1.bf16.msra.mxu0 %v3103_v30  ;;  %1089 = vmatpush1.bf16.msra.mxu1 %v3106_v32  ;;  %v3172_v28 = vld [vmem:[#allocation5 + $0x20] sm:$0xff]   ;;  %v3177_v32 = vld [vmem:[#allocation5 + $0xe8] sm:$0xff]   ;;  %v3183_v38 = vld [vmem:[#allocation5 + $0x78] sm:$0xff]  }
  0xab   : > { %1049 = vmatprep.subr.bf16.mxu0 %v3107_v31  ;;  %1090 = vmatprep.subr.bf16.mxu1 %v3110_v33  ;;  %v3174_v30 = vld [vmem:[#allocation5 + $0xa0] sm:$0xff]   ;;  %v3176_v31 = vld [vmem:[#allocation5 + $0x28] sm:$0xff]   ;;  %v3184_v39 = vld [vmem:[#allocation5 + $0x38] sm:$0xff]   ;;  %s591_s23 = scalar_lea.vmem %s3978_s8, %s3775_s30  ;;  %s2855_s30 = sshll.u32 %s3621_s22, 6 }
  0xac   : > { %v3178_v33 = vld [vmem:[#allocation5 + $0xa8] sm:$0xff]   ;;  %s3519_s22 = smov [#allocation10]  }
  0xad   : > { %p3982_p3 = scmp.ne.s32.totalorder %s3980_s29, 0  ;;  %s3436_s8 = sshll.u32 %s3519_s22, 4  ;;  %s3437_s8 = int_to_ptr.vmem [resolvable:$false] %s3436_s8 }
  0xae   : > { %1050 = vmatpush1.bf16.msra.mxu0 %v3109_v34  ;;  %1091 = vmatpush1.bf16.msra.mxu1 %v3112_v36  ;;  %v3179_v34 = vld [vmem:[#allocation5 + $0x70] sm:$0xff]  }
  0xaf   : > { %1051 = vmatprep.subr.bf16.mxu0 %v3113_v35  ;;  %1092 = vmatprep.subr.bf16.mxu1 %v3116_v40  ;;  %v3180_v35 = vld [vmem:[#allocation5 + $0x30] sm:$0xff]   ;;  %v3185_v40 = vld [vmem:[#allocation5 + $0xf8] sm:$0xff]  }
  0xb0   : > { %v3181_v36 = vld [vmem:[#allocation5 + $0xf0] sm:$0xff]  }
  0xb2   : > { %1052 = vmatpush1.bf16.msra.mxu0 %v3115_v41  ;;  %1093 = vmatpush1.bf16.msra.mxu1 %v3118_v43  ;;  %v3186_v41 = vld [vmem:[#allocation5 + $0xb8] sm:$0xff]  }
  0xb3   : > { %1053 = vmatprep.subr.bf16.mxu0 %v3119_v42  ;;  %1094 = vmatprep.subr.bf16.mxu1 %v3122_v46  ;;  %v3189_v42 = vld [vmem:[#allocation7 + $0x4] ss:$16 sps:$4 sm:$0xff]   ;;  %v3192_v43 = vld [vmem:[#allocation7 + $0xc] ss:$16 sps:$4 sm:$0xff]   ;;  %v666_v46 = vld [vmem:[%s3929_s7] sm:$0xf] }
  0xb6   : > { %1054 = vmatpush1.bf16.msra.mxu0 %v3121_v47  ;;  %1095 = vmatpush1.bf16.msra.mxu1 %v3124_v48  ;;  %v1019_v47 = vsub.s32 1, %v3778_v45  ;;  %v1023_v48 = vsub.s32 2, %v3778_v45 }
  0xb7   : > { %1055 = vmatprep.subr.bf16.mxu0 %v3125_v49  ;;  %1096 = vmatprep.subr.bf16.mxu1 %v3128_v52  ;;  %v1027_v49 = vsub.s32 3, %v3778_v45 }
  0xb8   : > { %v1020_v52 = vrot.slane %v666_v46, %v1019_v47  ;;  %v1024_v53 = vrot.slane %v666_v46, %v1023_v48 }
  0xb9   : > { %v1028_v55 = vrot.slane %v666_v46, %v1027_v49 }
  0xba   : > { %1056 = vmatpush1.bf16.msra.mxu0 %v3127_v50  ;;  %1097 = vmatpush1.bf16.msra.mxu1 %v3130_v54  ;;  %v1016_v50 = vrot.slane %v666_v46, %v3791_v44  ;;  %v3226_v46 = vld [vmem:[#allocation7 + $0xc8] ss:$16 sps:$4 sm:$0xff]  }
  0xbb   : > { %1057 = vmatprep.subr.bf16.mxu0 %v3131_v56  ;;  %1098 = vmatprep.subr.bf16.mxu1 %v3134_v59 }
  0xbe   : > { %1058 = vmatpush1.bf16.msra.mxu0 %v3133_v57  ;;  %1099 = vmatpush1.bf16.msra.mxu1 %v3136_v60 }
  0xbf   : > { %1059 = vmatprep.subr.bf16.mxu0 %v3137_v61  ;;  %1100 = vmatprep.subr.bf16.mxu1 %v3140_v63  ;;  %v3811_v61 = vld.sshfl [vmem:[%s599_s17] sm:$0x11 pattern:$0x75316420]  ;;  %s2501_s17 = sshll.u32 %s583_s20, 4  ;;  %s3882_s17 = int_to_ptr.vmem [resolvable:$true] %s2501_s17 }
  0xc0   : > { %s3432_s15 = scalar_lea.vmem %s3882_s17, 64  ;;  %p3439_p8 = scmp.lt.s32.totalorder %s3882_s17, %s3437_s8 }
  0xc1   : > { %p3433_p2 = scmp.ne.s32.totalorder %s3882_s17, %s3432_s15 }
  0xc2   : > { %1060 = vmatpush1.bf16.msra.mxu0 %v3139_v62  ;;  %1101 = vmatpush1.bf16.msra.mxu1 %v3142_v0 }
  0xc3   : > { %1061 = vmatprep.subr.bf16.mxu0 %v3143_v1  ;;  %1102 = vmatprep.subr.bf16.mxu1 %v3146_v3  ;;  %p3434_p4 = pnand %p3433_p2, %p3982_p3 }
  0xc5   : > { %p3435_p7 = pneg %p3434_p4 }
  0xc6   : > { %1062 = vmatpush1.bf16.msra.mxu0 %v3145_v2  ;;  %1103 = vmatpush1.bf16.msra.mxu1 %v3148_v4 }
  0xc7   : > { %1063 = vmatprep.subr.bf16.mxu0 %v3149_v5  ;;  %1104 = vmatprep.subr.bf16.mxu1 %v3152_v7 }
  0xca   : > { %1064 = vmatpush1.bf16.msra.mxu0 %v3151_v6  ;;  %1105 = vmatpush1.bf16.msra.mxu1 %v3154_v8 }
  0xcb   : > { %2859 = vmatprep.subr.bf16.mxu0 %v3155_v9  ;;  %2881 = vmatprep.subr.bf16.mxu1 %v3157_v12 }
  0xcd   : > { %1066 = vmatmul.mubr.bf16.vlgmr.msra.gmra.mrb[0].mxu0 %v682_v11  ;;  %1107 = vmatmul.mubr.bf16.vlgmr.msra.gmra.mrb[0].mxu1 %v682_v11 }
  0xce   : > { %2860 = vmatpush3.bf16.msra.mxu0 %v3156_v10  ;;  %2882 = vmatpush3.bf16.msra.mxu1 %v3158_v13  ;;  %v1538_v10 = vcombine.high %v3811_v61, %v3811_v61 }
  0xcf   : > { %2861 = vmatprep.subr.bf16.mxu0 %v3159_v14  ;;  %2883 = vmatprep.subr.bf16.mxu1 %v3161_v16  ;;  %v3187_v14 = vld [vmem:[#allocation7] ss:$16 sps:$4 sm:$0xff]  }
  0xd2   : > { %2862 = vmatpush3.bf16.msra.mxu0 %v3160_v15  ;;  %2884 = vmatpush3.bf16.msra.mxu1 %v3162_v18 }
  0xd3   : > { %2863 = vmatprep.subr.bf16.mxu0 %v3163_v17  ;;  %2885 = vmatprep.subr.bf16.mxu1 %v3165_v19  ;;  %v3195_v17 = vld [vmem:[#allocation7 + $0x24] ss:$16 sps:$4 sm:$0xff]   ;;  %v3190_v19 = vld [vmem:[#allocation7 + $0x8] ss:$16 sps:$4 sm:$0xff]  }
  0xd6   : > { %2864 = vmatpush3.bf16.msra.mxu0 %v3164_v20  ;;  %2886 = vmatpush3.bf16.msra.mxu1 %v3166_v22  ;;  %v1552_v20 = vrot.slane %v1538_v10, %v3786_v51  ;;  %v3193_v22 = vld [vmem:[#allocation7 + $0x20] ss:$16 sps:$4 sm:$0xff]   ;;  %v3267_v10 = vld [vmem:[#allocation7 + $0x1a4] ss:$16 sps:$4 sm:$0xff]  }
  0xd7   : > { %2865 = vmatprep.subr.bf16.mxu0 %v3167_v21  ;;  %2887 = vmatprep.subr.bf16.mxu1 %v3169_v23  ;;  %v3198_v21 = vld [vmem:[#allocation7 + $0x2c] ss:$16 sps:$4 sm:$0xff]   ;;  %v3201_v23 = vld [vmem:[#allocation7 + $0x44] ss:$16 sps:$4 sm:$0xff]  }
  0xda   : > { %2866 = vmatpush3.bf16.msra.mxu0 %v3168_v24  ;;  %2888 = vmatpush3.bf16.msra.mxu1 %v3170_v26  ;;  %v3196_v24 = vld [vmem:[#allocation7 + $0x28] ss:$16 sps:$4 sm:$0xff]   ;;  %v3199_v26 = vld [vmem:[#allocation7 + $0x40] ss:$16 sps:$4 sm:$0xff]  }
  0xdb   : > { %2867 = vmatprep.subr.bf16.mxu0 %v3171_v25  ;;  %2889 = vmatprep.subr.bf16.mxu1 %v3173_v27  ;;  %v3204_v25 = vld [vmem:[#allocation7 + $0x4c] ss:$16 sps:$4 sm:$0xff]   ;;  %v3207_v27 = vld [vmem:[#allocation7 + $0x64] ss:$16 sps:$4 sm:$0xff]  }
  0xde   : > { %2868 = vmatpush3.bf16.msra.mxu0 %v3172_v28  ;;  %2890 = vmatpush3.bf16.msra.mxu1 %v3174_v30  ;;  %v3202_v28 = vld [vmem:[#allocation7 + $0x48] ss:$16 sps:$4 sm:$0xff]   ;;  %v3205_v30 = vld [vmem:[#allocation7 + $0x60] ss:$16 sps:$4 sm:$0xff]  }
  0xdf   : > { %2869 = vmatprep.subr.bf16.mxu0 %v3175_v29  ;;  %2891 = vmatprep.subr.bf16.mxu1 %v3177_v32  ;;  %v3210_v29 = vld [vmem:[#allocation7 + $0x6c] ss:$16 sps:$4 sm:$0xff]   ;;  %v3208_v32 = vld [vmem:[#allocation7 + $0x68] ss:$16 sps:$4 sm:$0xff]  }
  0xe2   : > { %2870 = vmatpush3.bf16.msra.mxu0 %v3176_v31  ;;  %2892 = vmatpush3.bf16.msra.mxu1 %v3178_v33  ;;  %v3213_v31 = vld [vmem:[#allocation7 + $0x84] ss:$16 sps:$4 sm:$0xff]   ;;  %v3216_v33 = vld [vmem:[#allocation7 + $0x8c] ss:$16 sps:$4 sm:$0xff]  }
  0xe3   : > { %2871 = vmatprep.subr.bf16.mxu0 %v3179_v34  ;;  %2893 = vmatprep.subr.bf16.mxu1 %v3181_v36  ;;  %v3211_v34 = vld [vmem:[#allocation7 + $0x80] ss:$16 sps:$4 sm:$0xff]   ;;  %v3214_v36 = vld [vmem:[#allocation7 + $0x88] ss:$16 sps:$4 sm:$0xff]  }
  0xe6   : > { %2872 = vmatpush3.bf16.msra.mxu0 %v3180_v35  ;;  %2894 = vmatpush3.bf16.msra.mxu1 %v3182_v37  ;;  %v3219_v35 = vld [vmem:[#allocation7 + $0xa4] ss:$16 sps:$4 sm:$0xff]   ;;  %v3222_v37 = vld [vmem:[#allocation7 + $0xac] ss:$16 sps:$4 sm:$0xff]  }
  0xe7   : > { %2873 = vmatprep.subr.bf16.mxu0 %v3183_v38  ;;  %2895 = vmatprep.subr.bf16.mxu1 %v3185_v40  ;;  %v3217_v38 = vld [vmem:[#allocation7 + $0xa0] ss:$16 sps:$4 sm:$0xff]   ;;  %v3220_v40 = vld [vmem:[#allocation7 + $0xa8] ss:$16 sps:$4 sm:$0xff]  }
  0xea   : > { %2874 = vmatpush3.bf16.msra.mxu0 %v3184_v39  ;;  %2896 = vmatpush3.bf16.msra.mxu1 %v3186_v41  ;;  %v3225_v39 = vld [vmem:[#allocation7 + $0xc4] ss:$16 sps:$4 sm:$0xff]   ;;  %v3228_v41 = vld [vmem:[#allocation7 + $0xcc] ss:$16 sps:$4 sm:$0xff]  }
  0xeb   : > { %1896 = vmatprep.subr.bf16.mxu0 %v3189_v42  ;;  %1937 = vmatprep.subr.bf16.mxu1 %v3192_v43  ;;  %v3223_v42 = vld [vmem:[#allocation7 + $0xc0] ss:$16 sps:$4 sm:$0xff]   ;;  %v3231_v43 = vld [vmem:[#allocation7 + $0xe4] ss:$16 sps:$4 sm:$0xff]  }
 0x1a0   : > { %v1067_v54 = vpop.f32.mrb[0].mxu0  ;;  %v1108_v60 = vpop.f32.mrb[0].mxu1 }
 0x1a1   : > { %v1068_v56 = vadd.f32 %v1067_v54, %v1016_v50  ;;  %v1069_v57 = vpop.f32.mrb[1].mxu0  ;;  %v1109_v63 = vadd.f32 %v1108_v60, %v1024_v53  ;;  %v1110_v1 = vpop.f32.mrb[1].mxu1  ;;  %v3234_v50 = vld [vmem:[#allocation7 + $0xec] ss:$16 sps:$4 sm:$0xff]   ;;  %v3237_v53 = vld [vmem:[#allocation7 + $0x104] ss:$16 sps:$4 sm:$0xff]  }
 0x1a2   : > { %v1070_v58 = vadd.f32 %v1069_v57, %v1020_v52  ;;  %v1071_v59 = vpop.f32.mrb[2].mxu0  ;;  %v1111_v3 = vadd.f32 %v1110_v1, %v1028_v55  ;;  %v1112_v4 = vpop.f32.mrb[2].mxu1  ;;  %v3229_v52 = vld [vmem:[#allocation7 + $0xe0] ss:$16 sps:$4 sm:$0xff]   ;;  %v3232_v54 = vld [vmem:[#allocation7 + $0xe8] ss:$16 sps:$4 sm:$0xff]  }
 0x1a3   : > { %v1115_v62 = vmul.f32 0.2, %v1068_v56  ;;  %v1072_v0 = vpop.f32.mrb[3].mxu0  ;;  %v1117_v6 = vmul.f32 0.2, %v1109_v63  ;;  %v1113_v7 = vpop.f32.mrb[3].mxu1 }
 0x1a4   : > { %v1116_v2 = vmul.f32 0.2, %v1070_v58  ;;  %v1118_v9 = vmul.f32 0.2, %v1111_v3  ;;  %v3240_v55 = vld [vmem:[#allocation7 + $0x10c] ss:$16 sps:$4 sm:$0xff]  }
 0x1a5   : > { %v1119_v5 = vmax.f32 %v1068_v56, %v1115_v62  ;;  %v1121_v11 = vmax.f32 %v1109_v63, %v1117_v6  ;;  %v3235_v56 = vld [vmem:[#allocation7 + $0x100] ss:$16 sps:$4 sm:$0xff]   ;;  %v3243_v57 = vld [vmem:[#allocation7 + $0x124] ss:$16 sps:$4 sm:$0xff]   ;;  %v3246_v59 = vld [vmem:[#allocation7 + $0x12c] ss:$16 sps:$4 sm:$0xff]  }
 0x1a6   : > { %v1120_v8 = vmax.f32 %v1070_v58, %v1116_v2  ;;  %v1122_v13 = vmax.f32 %v1111_v3, %v1118_v9  ;;  %v3238_v58 = vld [vmem:[#allocation7 + $0x108] ss:$16 sps:$4 sm:$0xff]   ;;  %v3241_v60 = vld [vmem:[#allocation7 + $0x120] ss:$16 sps:$4 sm:$0xff]   ;;  %v3249_v62 = vld [vmem:[#allocation7 + $0x144] ss:$16 sps:$4 sm:$0xff]  }
 0x1a7   : > { %v1123_v15 = vpack.c.bf16 %v1119_v5, %v1119_v5  ;;  %v1125_v16 = vpack.c.bf16 %v1121_v11, %v1121_v11  ;;  %v3244_v63 = vld [vmem:[#allocation7 + $0x128] ss:$16 sps:$4 sm:$0xff]   ;;  %v3252_v0 = vld [vmem:[#allocation7 + $0x14c] ss:$16 sps:$4 sm:$0xff]   ;;  %v3247_v1 = vld [vmem:[#allocation7 + $0x140] ss:$16 sps:$4 sm:$0xff]  }
 0x1a8   : > { %v1124_v12 = vpack.c.bf16 %v1120_v8, %v1120_v8  ;;  %v1126_v18 = vpack.c.bf16 %v1122_v13, %v1122_v13  ;;  %v3255_v2 = vld [vmem:[#allocation7 + $0x164] ss:$16 sps:$4 sm:$0xff]   ;;  %v3250_v3 = vld [vmem:[#allocation7 + $0x148] ss:$16 sps:$4 sm:$0xff]   ;;  %v3258_v4 = vld [vmem:[#allocation7 + $0x16c] ss:$16 sps:$4 sm:$0xff]  }
 0x1a9   : > { %v3253_v5 = vld [vmem:[#allocation7 + $0x160] ss:$16 sps:$4 sm:$0xff]   ;;  %v3261_v6 = vld [vmem:[#allocation7 + $0x184] ss:$16 sps:$4 sm:$0xff]   ;;  %v3256_v7 = vld [vmem:[#allocation7 + $0x168] ss:$16 sps:$4 sm:$0xff]  }
 0x1aa   : > { %1416 = vmatprep.mubr.bf16.mxu0 %v1124_v12  ;;  %1456 = vmatprep.mubr.bf16.mxu1 %v1126_v18  ;;  %v3264_v8 = vld [vmem:[#allocation7 + $0x18c] ss:$16 sps:$4 sm:$0xff]   ;;  %v3259_v9 = vld [vmem:[#allocation7 + $0x180] ss:$16 sps:$4 sm:$0xff]   ;;  %v3262_v11 = vld [vmem:[#allocation7 + $0x188] ss:$16 sps:$4 sm:$0xff]  }
 0x1ab   : > { %1417 = vmatmul.mubr.bf16.vlgmr.msra.gmra.mrb[4].mxu0 %v1123_v15  ;;  %1457 = vmatmul.mubr.bf16.vlgmr.msra.gmra.mrb[4].mxu1 %v1125_v16  ;;  %v3270_v12 = vld [vmem:[#allocation7 + $0x1ac] ss:$16 sps:$4 sm:$0xff]   ;;  %v3265_v13 = vld [vmem:[#allocation7 + $0x1a0] ss:$16 sps:$4 sm:$0xff]   ;;  %v3268_v15 = vld [vmem:[#allocation7 + $0x1a8] ss:$16 sps:$4 sm:$0xff]  }
 0x1ac   : > { %1897 = vmatpush1.bf16.msra.mxu0 %v3187_v14  ;;  %1938 = vmatpush1.bf16.msra.mxu1 %v3190_v19  ;;  %v3273_v14 = vld [vmem:[#allocation7 + $0x1c4] ss:$16 sps:$4 sm:$0xff]   ;;  %v3276_v16 = vld [vmem:[#allocation7 + $0x1cc] ss:$16 sps:$4 sm:$0xff]   ;;  %v3274_v19 = vld [vmem:[#allocation7 + $0x1c8] ss:$16 sps:$4 sm:$0xff]  }
 0x1ad   : > { %1898 = vmatprep.subr.bf16.mxu0 %v3195_v17  ;;  %1928 = vmatprep.mubr.bf16.mxu0 %v1552_v20  ;;  %v3271_v17 = vld [vmem:[#allocation7 + $0x1c0] ss:$16 sps:$4 sm:$0xff]   ;;  %v3279_v18 = vld [vmem:[#allocation7 + $0x1e4] ss:$16 sps:$4 sm:$0xff]  }
 0x1ae   : > { %1939 = vmatprep.subr.bf16.mxu1 %v3198_v21  ;;  %1969 = vmatprep.mubr.bf16.mxu1 %v1552_v20  ;;  %v3282_v20 = vld [vmem:[#allocation7 + $0x1ec] ss:$16 sps:$4 sm:$0xff]   ;;  %v3277_v21 = vld [vmem:[#allocation7 + $0x1e0] ss:$16 sps:$4 sm:$0xff]  }
 0x1b0   : > { %1899 = vmatpush1.bf16.msra.mxu0 %v3193_v22  ;;  %1940 = vmatpush1.bf16.msra.mxu1 %v3196_v24  ;;  %v3280_v22 = vld [vmem:[#allocation7 + $0x1e8] ss:$16 sps:$4 sm:$0xff]   ;;  %v3283_v24 = vld [vmem:[#allocation8 + $0x40] sm:$0xff]  }
 0x1b1   : > { %1900 = vmatprep.subr.bf16.mxu0 %v3201_v23  ;;  %1941 = vmatprep.subr.bf16.mxu1 %v3204_v25  ;;  %v1545_v23 = vrot.slane %v3811_v61, %v3786_v51  ;;  %v3284_v25 = vld [vmem:[#allocation8] sm:$0xff]   ;;  %v3293_v51 = vld [vmem:[#allocation8 + $0xd0] sm:$0xff]  }
 0x1b2   : > { %v3292_v61 = vld [vmem:[#allocation8 + $0x10] sm:$0xff]  }
 0x1b4   : > { %1901 = vmatpush1.bf16.msra.mxu0 %v3199_v26  ;;  %1942 = vmatpush1.bf16.msra.mxu1 %v3202_v28  ;;  %v3285_v26 = vld [vmem:[#allocation8 + $0xc0] sm:$0xff]  }
 0x1b5   : > { %1902 = vmatprep.subr.bf16.mxu0 %v3207_v27  ;;  %1943 = vmatprep.subr.bf16.mxu1 %v3210_v29  ;;  %v3286_v27 = vld [vmem:[#allocation8 + $0x48] sm:$0xff]   ;;  %v3287_v28 = vld [vmem:[#allocation8 + $0x80] sm:$0xff]  }
 0x1b6   : > { %v3289_v29 = vld [vmem:[#allocation8 + $0xc8] sm:$0xff]  }
 0x1b8   : > { %1903 = vmatpush1.bf16.msra.mxu0 %v3205_v30  ;;  %1944 = vmatpush1.bf16.msra.mxu1 %v3208_v32  ;;  %v3288_v30 = vld [vmem:[#allocation8 + $0x8] sm:$0xff]   ;;  %v3290_v32 = vld [vmem:[#allocation8 + $0x50] sm:$0xff]  }
 0x1b9   : > { %1904 = vmatprep.subr.bf16.mxu0 %v3213_v31  ;;  %1945 = vmatprep.subr.bf16.mxu1 %v3216_v33  ;;  %v3291_v31 = vld [vmem:[#allocation8 + $0x88] sm:$0xff]   ;;  %v3295_v33 = vld [vmem:[#allocation8 + $0x90] sm:$0xff]  }
 0x1bc   : > { %1905 = vmatpush1.bf16.msra.mxu0 %v3211_v34  ;;  %1946 = vmatpush1.bf16.msra.mxu1 %v3214_v36  ;;  %v3294_v34 = vld [vmem:[#allocation8 + $0x58] sm:$0xff]  }
 0x1bd   : > { %1906 = vmatprep.subr.bf16.mxu0 %v3219_v35  ;;  %1947 = vmatprep.subr.bf16.mxu1 %v3222_v37  ;;  %v3297_v35 = vld [vmem:[#allocation8 + $0xd8] sm:$0xff]  }
 0x1be   : > { %v3296_v36 = vld [vmem:[#allocation8 + $0x18] sm:$0xff]  }
 0x1bf   : > { %v3299_v37 = vld [vmem:[#allocation8 + $0x98] sm:$0xff]  }
 0x1c0   : > { %1907 = vmatpush1.bf16.msra.mxu0 %v3217_v38  ;;  %1948 = vmatpush1.bf16.msra.mxu1 %v3220_v40  ;;  %v3298_v38 = vld [vmem:[#allocation8 + $0x60] sm:$0xff]  }
 0x1c1   : > { %1908 = vmatprep.subr.bf16.mxu0 %v3225_v39  ;;  %1949 = vmatprep.subr.bf16.mxu1 %v3228_v41  ;;  %v3301_v39 = vld [vmem:[#allocation8 + $0xe0] sm:$0xff]  }
 0x1c2   : > { %v3300_v40 = vld [vmem:[#allocation8 + $0x20] sm:$0xff]  }
 0x1c3   : > { %v3303_v41 = vld [vmem:[#allocation8 + $0xa0] sm:$0xff]  }
 0x1c4   : > { %1909 = vmatpush1.bf16.msra.mxu0 %v3223_v42  ;;  %1950 = vmatpush1.bf16.msra.mxu1 %v3226_v46  ;;  %v3302_v42 = vld [vmem:[#allocation8 + $0x68] sm:$0xff]  }
 0x1c5   : > { %1910 = vmatprep.subr.bf16.mxu0 %v3231_v43  ;;  %1951 = vmatprep.subr.bf16.mxu1 %v3234_v50  ;;  %v3304_v43 = vld [vmem:[#allocation8 + $0x28] sm:$0xff]  }
 0x1c6   : > { %v3305_v46 = vld [vmem:[#allocation8 + $0xe8] sm:$0xff]  }
 0x1c7   : > { %v3307_v50 = vld [vmem:[#allocation8 + $0xa8] sm:$0xff]  }
 0x1c8   : > { %1911 = vmatpush1.bf16.msra.mxu0 %v3229_v52  ;;  %1952 = vmatpush1.bf16.msra.mxu1 %v3232_v54  ;;  %v3306_v52 = vld [vmem:[#allocation8 + $0x70] sm:$0xff]  }
 0x1c9   : > { %1912 = vmatprep.subr.bf16.mxu0 %v3237_v53  ;;  %1953 = vmatprep.subr.bf16.mxu1 %v3240_v55  ;;  %v3308_v53 = vld [vmem:[#allocation8 + $0x30] sm:$0xff]  }
 0x1ca   : > { %v3309_v54 = vld [vmem:[#allocation8 + $0xf0] sm:$0xff]  }
 0x1cb   : > { %v3311_v55 = vld [vmem:[#allocation8 + $0xb0] sm:$0xff]  }
 0x1cc   : > { %1913 = vmatpush1.bf16.msra.mxu0 %v3235_v56  ;;  %1954 = vmatpush1.bf16.msra.mxu1 %v3238_v58  ;;  %v3310_v56 = vld [vmem:[#allocation8 + $0x78] sm:$0xff]  }
 0x1cd   : > { %1914 = vmatprep.subr.bf16.mxu0 %v3243_v57  ;;  %1955 = vmatprep.subr.bf16.mxu1 %v3246_v59  ;;  %v3312_v57 = vld [vmem:[#allocation8 + $0x38] sm:$0xff]  }
 0x1ce   : > { %v3313_v58 = vld [vmem:[#allocation8 + $0xf8] sm:$0xff]  }
 0x1cf   : > { %v3314_v59 = vld [vmem:[#allocation8 + $0xb8] sm:$0xff]  }
 0x1d0   : > { %1915 = vmatpush1.bf16.msra.mxu0 %v3241_v60  ;;  %1956 = vmatpush1.bf16.msra.mxu1 %v3244_v63  ;;  %v3517_v60 = vmov 0.0   ;;  %v1191_v63 = vld [vmem:[%s3931_s9] sm:$0x1] }
 0x1d1   : > { %1916 = vmatprep.subr.bf16.mxu0 %v3249_v62  ;;  %1957 = vmatprep.subr.bf16.mxu1 %v3252_v0 }
 0x1d4   : > { %1917 = vmatpush1.bf16.msra.mxu0 %v3247_v1  ;;  %1958 = vmatpush1.bf16.msra.mxu1 %v3250_v3 }
 0x1d5   : > { %1918 = vmatprep.subr.bf16.mxu0 %v3255_v2  ;;  %1959 = vmatprep.subr.bf16.mxu1 %v3258_v4 }
 0x1d8   : > { %1919 = vmatpush1.bf16.msra.mxu0 %v3253_v5  ;;  %1960 = vmatpush1.bf16.msra.mxu1 %v3256_v7 }
 0x1d9   : > { %1920 = vmatprep.subr.bf16.mxu0 %v3261_v6  ;;  %1961 = vmatprep.subr.bf16.mxu1 %v3264_v8 }
 0x1dc   : > { %1921 = vmatpush1.bf16.msra.mxu0 %v3259_v9  ;;  %1962 = vmatpush1.bf16.msra.mxu1 %v3262_v11  ;;  %v1529_v11 = vld [vmem:[%s3934_s12] sm:$0xf] }
 0x1dd   : > { %1922 = vmatprep.subr.bf16.mxu0 %v3267_v10  ;;  %1963 = vmatprep.subr.bf16.mxu1 %v3270_v12  ;;  %v1879_v12 = vrot.slane %v1529_v11, %v3791_v44 }
 0x1e0   : > { %1923 = vmatpush1.bf16.msra.mxu0 %v3265_v13  ;;  %1964 = vmatpush1.bf16.msra.mxu1 %v3268_v15  ;;  %v1883_v13 = vrot.slane %v1529_v11, %v1019_v47 }
 0x1e1   : > { %1924 = vmatprep.subr.bf16.mxu0 %v3273_v14  ;;  %1965 = vmatprep.subr.bf16.mxu1 %v3276_v16  ;;  %v1887_v14 = vrot.slane %v1529_v11, %v1023_v48  ;;  %v1891_v16 = vrot.slane %v1529_v11, %v1027_v49  ;;  %v3315_v48 = vld [vmem:[%s3824_s3] sm:$0x3f]   ;;  %s3880_s3 = scalar_lea.hbm %s3981_s28, %s2855_s30 }
 0x1e4   : > { %1925 = vmatpush1.bf16.msra.mxu0 %v3271_v17  ;;  %1966 = vmatpush1.bf16.msra.mxu1 %v3274_v19 }
 0x1e5   : > { %1926 = vmatprep.subr.bf16.mxu0 %v3279_v18  ;;  %1967 = vmatprep.subr.bf16.mxu1 %v3282_v20 }
 0x1e8   : > { %1927 = vmatpush1.bf16.msra.mxu0 %v3277_v21  ;;  %1968 = vmatpush1.bf16.msra.mxu1 %v3280_v22 }
 0x1e9   : > { %2903 = vmatprep.subr.bf16.mxu0 %v3283_v24  ;;  %2925 = vmatprep.subr.bf16.mxu1 %v3285_v26 }
 0x1eb   : > { %1929 = vmatmul.mubr.bf16.vlgmr.msra.gmra.mrb[8].mxu0 %v1545_v23  ;;  %1970 = vmatmul.mubr.bf16.vlgmr.msra.gmra.mrb[8].mxu1 %v1545_v23 }
 0x1ec   : > { %2904 = vmatpush3.bf16.msra.mxu0 %v3284_v25  ;;  %2926 = vmatpush3.bf16.msra.mxu1 %v3287_v28 }
 0x1ed   : > { %2905 = vmatprep.subr.bf16.mxu0 %v3286_v27  ;;  %2927 = vmatprep.subr.bf16.mxu1 %v3289_v29 }
 0x1f0   : > { %2906 = vmatpush3.bf16.msra.mxu0 %v3288_v30  ;;  %2928 = vmatpush3.bf16.msra.mxu1 %v3291_v31 }
 0x1f1   : > { %2907 = vmatprep.subr.bf16.mxu0 %v3290_v32  ;;  %2929 = vmatprep.subr.bf16.mxu1 %v3293_v51 }
 0x1f4   : > { %2908 = vmatpush3.bf16.msra.mxu0 %v3292_v61  ;;  %2930 = vmatpush3.bf16.msra.mxu1 %v3295_v33 }
 0x1f5   : > { %2909 = vmatprep.subr.bf16.mxu0 %v3294_v34  ;;  %2931 = vmatprep.subr.bf16.mxu1 %v3297_v35  ;;  %v2341_v34 = vsel %vm2339_vm0, %v3315_v48, 0 }
 0x1f8   : > { %2910 = vmatpush3.bf16.msra.mxu0 %v3296_v36  ;;  %2932 = vmatpush3.bf16.msra.mxu1 %v3299_v37  ;;  %v3316_v36 = vld [vmem:[%s3924_s2] sm:$0xff]  }
 0x1f9   : > { %2911 = vmatprep.subr.bf16.mxu0 %v3298_v38  ;;  %2933 = vmatprep.subr.bf16.mxu1 %v3301_v39  ;;  %v2327_v37 = vld [vmem:[%s3922_s0] sm:$0xf]  ;;  %v3317_v38 = vld [vmem:[%s3924_s2 + $0x8] sm:$0xff]   ;;  %v3318_v39 = vld [vmem:[%s3924_s2 + $0x10] sm:$0xff]  }
 0x1fc   : > { %2912 = vmatpush3.bf16.msra.mxu0 %v3300_v40  ;;  %2934 = vmatpush3.bf16.msra.mxu1 %v3303_v41  ;;  %v3319_v40 = vld [vmem:[%s3924_s2 + $0x18] sm:$0xff]  }
 0x1fd   : > { %2913 = vmatprep.subr.bf16.mxu0 %v3302_v42  ;;  %2935 = vmatprep.subr.bf16.mxu1 %v3305_v46  ;;  %v2054_v42 = vld [vmem:[%s3936_s14] sm:$0x1] }
 0x200   : > { %2914 = vmatpush3.bf16.msra.mxu0 %v3304_v43  ;;  %2936 = vmatpush3.bf16.msra.mxu1 %v3307_v50 }
 0x201   : > { %2915 = vmatprep.subr.bf16.mxu0 %v3306_v52  ;;  %2937 = vmatprep.subr.bf16.mxu1 %v3309_v54 }
 0x204   : > { %2916 = vmatpush3.bf16.msra.mxu0 %v3308_v53  ;;  %2938 = vmatpush3.bf16.msra.mxu1 %v3311_v55 }
 0x205   : > { %2917 = vmatprep.subr.bf16.mxu0 %v3310_v56  ;;  %2939 = vmatprep.subr.bf16.mxu1 %v3313_v58 }
 0x208   : > { %2918 = vmatpush3.bf16.msra.mxu0 %v3312_v57  ;;  %2940 = vmatpush3.bf16.msra.mxu1 %v3314_v59 }
 0x209   : > { %2954 = vmatprep.subr.bf16.mxu0 %v3517_v60  ;;  %2960 = vmatprep.subr.bf16.mxu1 %v3517_v60 }
 0x27e   : > { %v2875_v62 = vpop.f32.mrb[4].mxu0  ;;  %v2897_v3 = vpop.f32.mrb[4].mxu1 }
 0x27f   : > { %v2876_v0 = vpop.f32.mrb[5].mxu0  ;;  %v2898_v5 = vpop.f32.mrb[5].mxu1 }
 0x280   : > { %v2877_v1 = vadd.f32 %v2876_v0, %v2875_v62  ;;  %v2878_v2 = vpop.f32.mrb[6].mxu0  ;;  %v2899_v7 = vadd.f32 %v2898_v5, %v2897_v3  ;;  %v2900_v8 = vpop.f32.mrb[6].mxu1 }
 0x281   : > { %v2879_v4 = vpop.f32.mrb[7].mxu0  ;;  %v2901_v9 = vpop.f32.mrb[7].mxu1  ;;  %v2847_v2 = vld [vmem:[%s3979_s18] ss:$0 sm:$0xff] }
 0x282   : > { %v1419_v6 = vadd.f32 %v2877_v1, %v1191_v63  ;;  %v2853_v4 = vld [vmem:[%s591_s23] ss:$0 sm:$0xff]  ;;  %s3438_s23 = scalar_lea.vmem %s3437_s8, 128 }
 0x283   : > { %p3440_p11 = scmp.lt.s32.totalorder %s3438_s23, %s3432_s15 }
 0x284   : > { %v3829_v10 = vadd.f32 %v2899_v7, %v1419_v6 }
 0x285   : > { %p3441_p5 = por %p3440_p11, %p3439_p8 }
 0x286   : > { %v2478_v8 = vrot.slane %v3829_v10, %v3791_v44 }
 0x287   : > { %p3442_p0 = pnand %p3441_p5, %p3435_p7 }
 0x2be   : > { %v1930_v15 = vpop.f32.mrb[8].mxu0  ;;  %v1971_v21 = vpop.f32.mrb[8].mxu1 }
 0x2bf   : > { %v1931_v17 = vadd.f32 %v1930_v15, %v1879_v12  ;;  %v1932_v18 = vpop.f32.mrb[9].mxu0  ;;  %v1972_v23 = vadd.f32 %v1971_v21, %v1887_v14  ;;  %v1973_v25 = vpop.f32.mrb[9].mxu1 }
 0x2c0   : > { %v1933_v19 = vadd.f32 %v1932_v18, %v1883_v13  ;;  %v1934_v20 = vpop.f32.mrb[10].mxu0  ;;  %v1974_v27 = vadd.f32 %v1973_v25, %v1891_v16  ;;  %v1975_v47 = vpop.f32.mrb[10].mxu1 }
 0x2c1   : > { %v1978_v22 = vmul.f32 0.2, %v1931_v17  ;;  %v1935_v24 = vpop.f32.mrb[11].mxu0  ;;  %v1980_v29 = vmul.f32 0.2, %v1972_v23  ;;  %v1976_v30 = vpop.f32.mrb[11].mxu1 }
 0x2c2   : > { %v1979_v26 = vmul.f32 0.2, %v1933_v19  ;;  %v1981_v45 = vmul.f32 0.2, %v1974_v27 }
 0x2c3   : > { %v1982_v28 = vmax.f32 %v1931_v17, %v1978_v22  ;;  %v1984_v49 = vmax.f32 %v1972_v23, %v1980_v29 }
 0x2c4   : > { %v1983_v31 = vmax.f32 %v1933_v19, %v1979_v26  ;;  %v1985_v51 = vmax.f32 %v1974_v27, %v1981_v45 }
 0x2c5   : > { %v1986_v61 = vpack.c.bf16 %v1982_v28, %v1982_v28  ;;  %v1988_v33 = vpack.c.bf16 %v1984_v49, %v1984_v49 }
 0x2c6   : > { %v1987_v32 = vpack.c.bf16 %v1983_v31, %v1983_v31  ;;  %v1989_v35 = vpack.c.bf16 %v1985_v51, %v1985_v51 }
 0x2c8   : > { %2279 = vmatprep.mubr.bf16.mxu0 %v1987_v32  ;;  %2319 = vmatprep.mubr.bf16.mxu1 %v1989_v35 }
 0x2c9   : > { %2280 = vmatmul.mubr.bf16.vlgmr.msra.gmra.mrb[12].mxu0 %v1986_v61  ;;  %2320 = vmatmul.mubr.bf16.vlgmr.msra.gmra.mrb[12].mxu1 %v1988_v33 }
 0x2ca   : > { %2955 = vmatpush3.bf16.msra.mxu0 %v2341_v34  ;;  %2956 = vmatprep.mubr.msk.bf16.mxu0 %vm3518_vm1, %v3517_v60 }
 0x2cb   : > { %2961 = vmatpush3.bf16.msra.mxu1 %v3316_v36  ;;  %2968 = vmatprep.mubr.msk.bf16.mxu1 %vm3518_vm1, %v3517_v60 }
 0x2cc   : > { %2962 = vmatprep.subr.bf16.mxu1 %v3517_v60 }
 0x2cf   : > { %2963 = vmatpush3.bf16.msra.mxu1 %v3317_v38 }
 0x2d0   : > { %2964 = vmatprep.subr.bf16.mxu1 %v3517_v60 }
 0x2d1   : > { %2957 = vmatmul.mubr.msk.bf16.vlgmr.msra.gmra.mrb[16].mxu0 %vm2335_vm2, %v2327_v37 }
 0x2d3   : > { %2965 = vmatpush3.bf16.msra.mxu1 %v3318_v39 }
 0x2d4   : > { %2966 = vmatprep.subr.bf16.mxu1 %v3517_v60 }
 0x2d7   : > { %2967 = vmatpush3.bf16.msra.mxu1 %v3319_v40 }
 0x39c   : > { %v2919_v41 = vpop.f32.mrb[12].mxu0  ;;  %v2941_v52 = vpop.f32.mrb[12].mxu1 }
 0x39d   : > { %v2920_v43 = vpop.f32.mrb[13].mxu0  ;;  %v2942_v54 = vpop.f32.mrb[13].mxu1 }
 0x39e   : > { %v2921_v46 = vadd.f32 %v2920_v43, %v2919_v41  ;;  %v2922_v50 = vpop.f32.mrb[14].mxu0  ;;  %v2943_v56 = vadd.f32 %v2942_v54, %v2941_v52  ;;  %v2944_v57 = vpop.f32.mrb[14].mxu1 }
 0x39f   : > { %v2923_v53 = vpop.f32.mrb[15].mxu0  ;;  %v2945_v58 = vpop.f32.mrb[15].mxu1 }
 0x3a0   : > { %v2282_v55 = vadd.f32 %v2921_v46, %v2054_v42 }
 0x3a2   : > { %v2322_v59 = vadd.f32 %v2943_v56, %v2282_v55 }
 0x3a4   : > { %v2377_v60 = vpop.f32.mrb[16].mxu0  ;;  %v2483_v12 = vrot.slane %v2322_v59, %v3791_v44 }
 0x3a5   : > { %v2383_v62 = vpack.c.bf16 %v2377_v60, %v2377_v60  ;;  %v2958_v63 = vpop.f32.mrb[17].mxu0 }
 0x3a6   : > { %v2380_v0 = vpop.f32.mrb[18].mxu0 }
 0x3a7   : > { %v2959_v1 = vpop.f32.mrb[19].mxu0  ;;  %2969 = vmatmul.mubr.msk.bf16.vlgmr.msra.gmra.mrb[16].mxu1 %vm2423_vm3, %v2383_v62 }
 0x47a   : > { %v2461_v3 = vpop.f32.mrb[16].mxu1 }
 0x47b   : > { %v2462_v5 = vadd.f32 %v2847_v2, %v2461_v3  ;;  %v2970_v6 = vpop.f32.mrb[17].mxu1 }
 0x47c   : > { %v2464_v7 = vpop.f32.mrb[18].mxu1 }
 0x47d   : > { %v2474_v9 = vadd.f32 %v2853_v4, %v2462_v5  ;;  %v2971_v11 = vpop.f32.mrb[19].mxu1 }
 0x47f   : > { %v2479_v13 = vadd.f32 %v2478_v8, %v2474_v9 }
 0x481   : > { %v2484_v14 = vadd.f32 %v2483_v12, %v2479_v13 }
 0x483   : > { %v2485_v15 = vpack.c.bf16 %v2484_v14, %v2484_v14 }
 0x485   : > { %2486 = vst [vmem:[%s583_s20] sm:$0xf] %v2485_v15 }
 0x486   : > { %3445 = shalt.err (!%p3442_p0)
}
 0x487   : > { %s3446_s16 = scalar_lea.hbm %s3880_s3, 64  ;;  %s3450_s18 = scalar_lea.hbm %s3981_s28, 128 }
 0x488   : > { %p3447_p6 = scmp.ne.s32.totalorder %s3880_s3, %s3446_s16  ;;  %p3451_p13 = scmp.lt.u32.totalorder %s3880_s3, %s3981_s28 }
 0x489   : > { %p3452_p12 = scmp.lt.u32.totalorder %s3450_s18, %s3446_s16  ;;  %p3454_p2 = scmp.lt.u32.totalorder %s3446_s16, %s3880_s3 }
 0x48a   : > { %p3448_p9 = pnand %p3447_p6, %p3982_p3 }
 0x48b   : > { %p3453_p1 = por %p3452_p12, %p3451_p13 }
 0x48c   : > { %p3449_p10 = pneg %p3448_p9 }
 0x48d   : > { %p3455_p4 = por %p3454_p2, %p3453_p1 }
 0x48f   : > { %p3456_p7 = pnand %p3455_p4, %p3449_p10 }
 0x491   : > { %3459 = shalt.err (!%p3456_p7)
}
 0x492   : > { %2988 = dma.vmem_to_hbm [thread:$0]  (%p3982_p3), %s3882_s17, 64, %s3880_s3, %s2488_s24  }
 0x493 PF: > { %s3983_s20 = sld [smem:[#allocation17_spill]]  ;;  %s3984_s4 = sld [smem:[#allocation15_spill]] }
 0x494   : > { %s3985_s26 = sld [smem:[#allocation21_spill]] }
 0x499   : > { %p3015_p8 = scmp.ge.s32.totalorder %s3983_s20, 2  ;;  %s2513_s15 = sand.u32 1, %s3984_s4  }
 0x49a   : > { %p3986_p11 = scmp.ne.s32.totalorder %s3985_s26, 0  ;;  %s2514_s22 = scalar_lea.sflag [#allocation4], %s2513_s15 }
 0x49c   : > { %p3004_p5 = pnand %p3015_p8, %p3986_p11 }
 0x49e   : > { %3489 = dma.done.wait (!%p3004_p5), %s2514_s22, 64  }
 0x49f   : > { %3491 = vsyncadd (!%p3004_p5), %s2514_s22, 4294967232  ;;  %s3987_s21 = sld [smem:[#allocation18_spill]]  ;;  %s3988_s8 = sld [smem:[#allocation16_spill]] }
 0x4a0   : > { %s3989_s20 = sld [smem:[#allocation19_spill]]  ;;  %s3990_s18 = smov %s3498_s19 }
 0x4a5   : > { %p28_p0 = scmp.ge.s32.totalorder %s3987_s21, 4   ;;  %s3991_s19 = smov %s3988_s8 }
 0x4a7   :  { %30 = sbr.rel (!%p28_p0) target bundleno = 11 (0xb), region = 141 }
 0x4ae   :  { %2519 = vsyncpa [#allocation3], 1 }
 0x4af   :  { %2521 = vsyncpa [#allocation3 + $0x1], 1 }
 0x4b0   :  { %2522 = vsyncpa [#allocation6], 1 }
 0x4b1   :  { %2523 = vsyncpa [#allocation9], 1 }
 0x4b2   :  { %2524 = vsyncpa [#allocation4], 1 }
 0x4b3   :  { %2526 = vsyncpa [#allocation4 + $0x1], 1 }

</bundles_post_ra>
